<compile_context>
chip_gen: v7x
topology: tpu7x:2x2x1
jax: 0.10.0
libtpu: 0.0.40
codegen_flags: <defaults>
</compile_context>

<pallas_src>
import math
import jax
import jax.numpy as jnp
from jax.experimental import pallas as pl
from jax.experimental.pallas import tpu as pltpu

# Small, module-consistent shapes.
N, L, E, H, NUM_LAYERS = 2, 8, 32, 4, 2
D = E // H
R = N * L               # flattened (batch, seq) rows carried through the stack
EPS = 1e-5              # torch.nn.LayerNorm default
NEG_INF = -1e20         # masked_fill value from the reference


def _layer_norm(v, g, b):
    mu = jnp.mean(v, axis=-1, keepdims=True)
    var = jnp.mean((v - mu) ** 2, axis=-1, keepdims=True)
    return (v - mu) * jax.lax.rsqrt(var + EPS) * g + b


def encoder_kernel(x_ref, bias_ref,
                   wq_ref, wk_ref, wv_ref, wo_ref, bo_ref,
                   g1_ref, b1_ref, g2_ref, b2_ref,
                   w1_ref, bb1_ref, w2_ref, bb2_ref,
                   out_ref):
    """Whole encoder in one invocation.

    Weights are pre-transposed / pre-split per head in the wrapper:
      wq/wk/wv_ref : (layers, H, E, D)  block h selects head h's input lanes and
                                        applies the shared (D,D) weight
                                        (1/sqrt(E) folded into Q only)
      wo_ref       : (layers, H, D, E)  per-head row-block of fc_out's weight
      bias_ref     : (H, R, R)          additive mask, fully pre-broadcast
    """
    num_layers = wq_ref.shape[0]
    h = x_ref[...]                      # (R, E) activation carry
    bias = bias_ref[...]                # (H, R, R); no in-kernel broadcasts

    # NUM_LAYERS == 2 -> keep the loop unrolled (review: only switch to
    # lax.fori_loop with dynamic ref[l] indexing for deeper stacks).
    for l in range(num_layers):
        # ---- multi-head self attention (head-batched, no lane slicing) -------
        # Three separate head-batched projections (no fused 3E output to slice).
        hb = jnp.broadcast_to(h[None], (H, R, E))         # one leading broadcast / layer
        q = jnp.einsum('hre,hed->hrd', hb, wq_ref[l],
                       preferred_element_type=jnp.float32)   # (H, R, D), pre-scaled
        k = jnp.einsum('hre,hed->hrd', hb, wk_ref[l],
                       preferred_element_type=jnp.float32)
        v = jnp.einsum('hre,hed->hrd', hb, wv_ref[l],
                       preferred_element_type=jnp.float32)

        # One batched contraction over all heads.  Queries/keys from different
        # batch rows are kept apart by the precomputed additive mask (-1e20 for
        # cross-batch pairs, same as padded keys).
        s = jnp.einsum('hqd,hkd->hqk', q, k,
                       preferred_element_type=jnp.float32) + bias    # (H, R, R)
        smax = jnp.max(s, axis=-1, keepdims=True)
        p = jnp.exp(s - smax)
        attn = p / jnp.sum(p, axis=-1, keepdims=True)     # exact divide (review)
        o = jnp.einsum('hqk,hkd->hqd', attn, v,
                       preferred_element_type=jnp.float32)            # (H, R, D)

        # ---- fc_out with the head-concat folded into per-head weight blocks --
        # y = sum_h o[h] @ wo_block[h]: one batched matmul + (H-1) VPU adds on
        # major-axis slices (no 8-lane concat, no lane relayout).
        t = jnp.einsum('hrd,hde->hre', o, wo_ref[l],
                       preferred_element_type=jnp.float32)            # (H, R, E)
        y = bo_ref[l]
        for hd in range(H):
            y = y + t[hd]

        # ---- residual + LayerNorm1 -------------------------------------------
        x1 = _layer_norm(y + h, g1_ref[l], b1_ref[l])

        # ---- feed-forward (Linear -> ReLU -> Linear) + residual + LayerNorm2 --
        hid = jnp.maximum(
            jnp.dot(x1, w1_ref[l], preferred_element_type=jnp.float32) + bb1_ref[l],
            0.0)
        ff = jnp.dot(hid, w2_ref[l], preferred_element_type=jnp.float32) + bb2_ref[l]
        h = _layer_norm(ff + x1, g2_ref[l], b2_ref[l])

    # Single full-width store of the carried activation (E=32 < 128 lanes is
    # inherent to the module's sizing; acknowledged overhead, see review).
    out_ref[...] = h


def encoder_forward(x, mask, params):
    wq, wk, wv, wo, bo, g1, b1, g2, b2, w1, bb1, w2, bb2 = params
    nl = wq.shape[0]
    scale = 1.0 / math.sqrt(E)          # attention / embed_size ** 0.5 (as in ref)
    eye_h = jnp.eye(H, dtype=jnp.float32)

    def head_blocks_in(w, s=1.0):
        # (layers, D, D) torch (out,in) -> (layers, H, E, D): block h selects head
        # h's input lanes and applies w.T * s.  The kernel sees H batched (E, D)
        # blocks, never a dense kron-inflated (E, E) MXU operand.
        bd = jax.vmap(lambda m: jnp.kron(eye_h, m.T * s))(w)        # (layers, E, E)
        return bd.reshape(nl, E, H, D).transpose(0, 2, 1, 3)        # (layers, H, E, D)

    wq_sel = head_blocks_in(wq, scale)  # 1/sqrt(E) folded into the Q blocks only
    wk_sel = head_blocks_in(wk)
    wv_sel = head_blocks_in(wv)
    wo_sel = jnp.swapaxes(wo, -1, -2).reshape(nl, H, D, E)          # (layers, H, D, E)
    w1_t = jnp.swapaxes(w1, -1, -2)     # (layers, E, 2E)   (in, out)
    w2_t = jnp.swapaxes(w2, -1, -2)     # (layers, 2E, E)

    # Additive attention bias, fully pre-broadcast to the in-kernel score shape
    # (H, R, R): -1e20 at padded keys and at cross-batch (query, key) pairs.
    same_batch = jnp.kron(jnp.eye(N, dtype=jnp.float32),
                          jnp.ones((L, L), jnp.float32))            # (R, R)
    key_ok = jnp.broadcast_to(mask.reshape(1, R), (R, R))           # (R, R)
    bias2d = jnp.where((same_batch * key_ok) > 0.0, 0.0, NEG_INF).astype(jnp.float32)
    bias = jnp.broadcast_to(bias2d[None], (H, R, R))                # (H, R, R)

    vmem = pl.BlockSpec(memory_space=pltpu.MemorySpace.VMEM)
    out2d = pl.pallas_call(
        encoder_kernel,
        out_shape=jax.ShapeDtypeStruct((R, E), jnp.float32),
        in_specs=[vmem] * 15,
        out_specs=vmem,
        input_output_aliases={0: 0},    # x buffer is fully overwritten by the carry
    )(x.reshape(R, E), bias, wq_sel, wk_sel, wv_sel, wo_sel, bo,
      g1, b1, g2, b2, w1_t, bb1, w2_t, bb2)
    return out2d.reshape(N, L, E)


def init_params(key, num_layers):
    """Deterministic init mimicking torch defaults (uniform(-1/sqrt(fan_in), ...),
    LayerNorm gamma=1, beta=0).  Weights kept in torch (out, in) layout."""
    keys = jax.random.split(key, num_layers * 9)

    def u(k, shape, fan_in):
        bound = 1.0 / math.sqrt(fan_in)
        return jax.random.uniform(k, shape, jnp.float32, -bound, bound)

    lists = {n: [] for n in
             ("wq", "wk", "wv", "wo", "bo", "g1", "b1", "g2", "b2",
              "w1", "bb1", "w2", "bb2")}
    for i in range(num_layers):
        k = keys[i * 9:(i + 1) * 9]
        lists["wq"].append(u(k[0], (D, D), D))
        lists["wk"].append(u(k[1], (D, D), D))
        lists["wv"].append(u(k[2], (D, D), D))
        lists["wo"].append(u(k[3], (E, E), E))
        lists["bo"].append(u(k[4], (1, E), E))
        lists["g1"].append(jnp.ones((1, E), jnp.float32))
        lists["b1"].append(jnp.zeros((1, E), jnp.float32))
        lists["g2"].append(jnp.ones((1, E), jnp.float32))
        lists["b2"].append(jnp.zeros((1, E), jnp.float32))
        lists["w1"].append(u(k[5], (2 * E, E), E))
        lists["bb1"].append(u(k[6], (1, 2 * E), E))
        lists["w2"].append(u(k[7], (E, 2 * E), 2 * E))
        lists["bb2"].append(u(k[8], (1, E), 2 * E))
    order = ("wq", "wk", "wv", "wo", "bo", "g1", "b1", "g2", "b2",
             "w1", "bb1", "w2", "bb2")
    return tuple(jnp.stack(lists[n], axis=0) for n in order)


def encoder_ref(x, mask, params):
    """Pure-JAX reference mirroring the PyTorch forward."""
    wq, wk, wv, wo, bo, g1, b1, g2, b2, w1, bb1, w2, bb2 = params
    h = x
    scale = 1.0 / math.sqrt(E)
    for l in range(wq.shape[0]):
        hr = h.reshape(N, L, H, D)
        q = hr @ wq[l].T
        k = hr @ wk[l].T
        v = hr @ wv[l].T
        scores = jnp.einsum("nqhd,nkhd->nhqk", q, k)
        m = mask[:, None, None, :]
        scores = jnp.where(m == 0.0, NEG_INF, scores)
        attn = jax.nn.softmax(scores * scale, axis=-1)
        o = jnp.einsum("nhql,nlhd->nqhd", attn, v).reshape(N, L, E)
        y = o @ wo[l].T + bo[l][0]
        x1 = _layer_norm(y + h, g1[l][0], b1[l][0])
        hid = jnp.maximum(x1 @ w1[l].T + bb1[l][0], 0.0)
        ff = hid @ w2[l].T + bb2[l][0]
        h = _layer_norm(ff + x1, g2[l][0], b2[l][0])
    return h


if __name__ == "__main__":
    key = jax.random.PRNGKey(0)
    kx, kp = jax.random.split(key)
    x = jax.random.normal(kx, (N, L, E), dtype=jnp.float32)
    # mask pattern analogous to (tokens != 0) in the reference usage
    mask = jnp.array(
        [[1, 1, 1, 1, 0, 0, 0, 0],
         [1, 0, 0, 0, 0, 0, 0, 0]], dtype=jnp.float32)
    params = init_params(kp, NUM_LAYERS)

    out = encoder_forward(x, mask, params)
    out = jax.block_until_ready(out)
    assert out.shape == (N, L, E)

    ref = encoder_ref(x, mask, params)
    err = float(jnp.max(jnp.abs(out - ref)))
    assert err < 5e-4, f"max abs err vs reference: {err}"

    print("KERNEL_OK")
</pallas_src>

<mosaic_0001>
module attributes {stable_mosaic.version = 11 : i64} {
  func.func @encoder_kernel(%arg0: memref<16x32xf32, #tpu.memory_space<vmem>>, %arg1: memref<4x16x16xf32, #tpu.memory_space<vmem>>, %arg2: memref<2x4x32x8xf32, #tpu.memory_space<vmem>>, %arg3: memref<2x4x32x8xf32, #tpu.memory_space<vmem>>, %arg4: memref<2x4x32x8xf32, #tpu.memory_space<vmem>>, %arg5: memref<2x4x8x32xf32, #tpu.memory_space<vmem>>, %arg6: memref<2x1x32xf32, #tpu.memory_space<vmem>>, %arg7: memref<2x1x32xf32, #tpu.memory_space<vmem>>, %arg8: memref<2x1x32xf32, #tpu.memory_space<vmem>>, %arg9: memref<2x1x32xf32, #tpu.memory_space<vmem>>, %arg10: memref<2x1x32xf32, #tpu.memory_space<vmem>>, %arg11: memref<2x32x64xf32, #tpu.memory_space<vmem>>, %arg12: memref<2x1x64xf32, #tpu.memory_space<vmem>>, %arg13: memref<2x64x32xf32, #tpu.memory_space<vmem>>, %arg14: memref<2x1x32xf32, #tpu.memory_space<vmem>>, %arg15: memref<16x32xf32, #tpu.memory_space<vmem>>) attributes {dimension_semantics = [], scalar_prefetch = 0 : i64, scratch_operands = 0 : i64, tpu.core_type = #tpu.core_type<tc>} {
    %c0 = arith.constant 0 : index
    %c0_0 = arith.constant 0 : index
    %0 = vector.load %arg0[%c0, %c0_0] : memref<16x32xf32, #tpu.memory_space<vmem>>, vector<16x32xf32>
    %c0_1 = arith.constant 0 : index
    %c0_2 = arith.constant 0 : index
    %c0_3 = arith.constant 0 : index
    %1 = vector.load %arg1[%c0_1, %c0_2, %c0_3] : memref<4x16x16xf32, #tpu.memory_space<vmem>>, vector<4x16x16xf32>
    %2 = vector.shape_cast %0 : vector<16x32xf32> to vector<1x16x32xf32>
    %3 = vector.shape_cast %2 : vector<1x16x32xf32> to vector<1x16x32xf32>
    %4 = vector.broadcast %3 : vector<1x16x32xf32> to vector<4x16x32xf32>
    %c0_4 = arith.constant 0 : index
    %c0_5 = arith.constant 0 : index
    %c0_6 = arith.constant 0 : index
    %c0_7 = arith.constant 0 : index
    %5 = vector.load %arg2[%c0_4, %c0_5, %c0_6, %c0_7] : memref<2x4x32x8xf32, #tpu.memory_space<vmem>>, vector<1x4x32x8xf32>
    %6 = vector.shape_cast %5 : vector<1x4x32x8xf32> to vector<4x32x8xf32>
    "tpu.trace_start"() <{level = 10 : i32, message = "hre,hed->hrd"}> : () -> ()
    %cst = arith.constant dense<0.000000e+00> : vector<4x16x8xf32>
    %7 = tpu.matmul %4, %6, %cst {dimension_numbers = #tpu.dot_dimension_numbers<[2], [1], [1], [2], [0, 0, 0, 1, 1, 2], [0], [0]>} : vector<4x16x32xf32>, vector<4x32x8xf32>, vector<4x16x8xf32> -> vector<4x16x8xf32>
    "tpu.trace_stop"() : () -> ()
    %c0_8 = arith.constant 0 : index
    %c0_9 = arith.constant 0 : index
    %c0_10 = arith.constant 0 : index
    %c0_11 = arith.constant 0 : index
    %8 = vector.load %arg3[%c0_8, %c0_9, %c0_10, %c0_11] : memref<2x4x32x8xf32, #tpu.memory_space<vmem>>, vector<1x4x32x8xf32>
    %9 = vector.shape_cast %8 : vector<1x4x32x8xf32> to vector<4x32x8xf32>
    "tpu.trace_start"() <{level = 10 : i32, message = "hre,hed->hrd"}> : () -> ()
    %cst_12 = arith.constant dense<0.000000e+00> : vector<4x16x8xf32>
    %10 = tpu.matmul %4, %9, %cst_12 {dimension_numbers = #tpu.dot_dimension_numbers<[2], [1], [1], [2], [0, 0, 0, 1, 1, 2], [0], [0]>} : vector<4x16x32xf32>, vector<4x32x8xf32>, vector<4x16x8xf32> -> vector<4x16x8xf32>
    "tpu.trace_stop"() : () -> ()
    %c0_13 = arith.constant 0 : index
    %c0_14 = arith.constant 0 : index
    %c0_15 = arith.constant 0 : index
    %c0_16 = arith.constant 0 : index
    %11 = vector.load %arg4[%c0_13, %c0_14, %c0_15, %c0_16] : memref<2x4x32x8xf32, #tpu.memory_space<vmem>>, vector<1x4x32x8xf32>
    %12 = vector.shape_cast %11 : vector<1x4x32x8xf32> to vector<4x32x8xf32>
    "tpu.trace_start"() <{level = 10 : i32, message = "hre,hed->hrd"}> : () -> ()
    %cst_17 = arith.constant dense<0.000000e+00> : vector<4x16x8xf32>
    %13 = tpu.matmul %4, %12, %cst_17 {dimension_numbers = #tpu.dot_dimension_numbers<[2], [1], [1], [2], [0, 0, 0, 1, 1, 2], [0], [0]>} : vector<4x16x32xf32>, vector<4x32x8xf32>, vector<4x16x8xf32> -> vector<4x16x8xf32>
    "tpu.trace_stop"() : () -> ()
    "tpu.trace_start"() <{level = 10 : i32, message = "hqd,hkd->hqk"}> : () -> ()
    %cst_18 = arith.constant dense<0.000000e+00> : vector<4x16x16xf32>
    %14 = tpu.matmul %7, %10, %cst_18 {dimension_numbers = #tpu.dot_dimension_numbers<[2], [2], [1], [1], [0, 0, 0, 1, 1, 1], [0], [0]>} : vector<4x16x8xf32>, vector<4x16x8xf32>, vector<4x16x16xf32> -> vector<4x16x16xf32>
    "tpu.trace_stop"() : () -> ()
    %15 = arith.addf %14, %1 : vector<4x16x16xf32>
    %cst_19 = arith.constant dense<0xFF800000> : vector<4x16xf32>
    %16 = vector.multi_reduction <maximumf>, %15, %cst_19 [2] : vector<4x16x16xf32> to vector<4x16xf32>
    %17 = vector.shape_cast %16 : vector<4x16xf32> to vector<4x16x1xf32>
    %18 = vector.broadcast %17 : vector<4x16x1xf32> to vector<4x16x16xf32>
    %19 = arith.subf %15, %18 : vector<4x16x16xf32>
    %20 = math.exp %19 : vector<4x16x16xf32>
    %cst_20 = arith.constant dense<0.000000e+00> : vector<4x16xf32>
    %21 = vector.multi_reduction <add>, %20, %cst_20 [2] : vector<4x16x16xf32> to vector<4x16xf32>
    %22 = vector.shape_cast %21 : vector<4x16xf32> to vector<4x16x1xf32>
    %23 = vector.broadcast %22 : vector<4x16x1xf32> to vector<4x16x16xf32>
    %24 = arith.divf %20, %23 : vector<4x16x16xf32>
    "tpu.trace_start"() <{level = 10 : i32, message = "hqk,hkd->hqd"}> : () -> ()
    %cst_21 = arith.constant dense<0.000000e+00> : vector<4x16x8xf32>
    %25 = tpu.matmul %24, %13, %cst_21 {dimension_numbers = #tpu.dot_dimension_numbers<[2], [1], [1], [2], [0, 0, 0, 1, 1, 2], [0], [0]>} : vector<4x16x16xf32>, vector<4x16x8xf32>, vector<4x16x8xf32> -> vector<4x16x8xf32>
    "tpu.trace_stop"() : () -> ()
    %c0_22 = arith.constant 0 : index
    %c0_23 = arith.constant 0 : index
    %c0_24 = arith.constant 0 : index
    %c0_25 = arith.constant 0 : index
    %26 = vector.load %arg5[%c0_22, %c0_23, %c0_24, %c0_25] : memref<2x4x8x32xf32, #tpu.memory_space<vmem>>, vector<1x4x8x32xf32>
    %27 = vector.shape_cast %26 : vector<1x4x8x32xf32> to vector<4x8x32xf32>
    "tpu.trace_start"() <{level = 10 : i32, message = "hrd,hde->hre"}> : () -> ()
    %cst_26 = arith.constant dense<0.000000e+00> : vector<4x16x32xf32>
    %28 = tpu.matmul %25, %27, %cst_26 {dimension_numbers = #tpu.dot_dimension_numbers<[2], [1], [1], [2], [0, 0, 0, 1, 1, 2], [0], [0]>} : vector<4x16x8xf32>, vector<4x8x32xf32>, vector<4x16x32xf32> -> vector<4x16x32xf32>
    "tpu.trace_stop"() : () -> ()
    %c0_27 = arith.constant 0 : index
    %c0_28 = arith.constant 0 : index
    %c0_29 = arith.constant 0 : index
    %29 = vector.load %arg6[%c0_27, %c0_28, %c0_29] : memref<2x1x32xf32, #tpu.memory_space<vmem>>, vector<1x1x32xf32>
    %30 = vector.shape_cast %29 : vector<1x1x32xf32> to vector<1x32xf32>
    %31 = vector.extract_strided_slice %28 {offsets = [0, 0, 0], sizes = [1, 16, 32], strides = [1, 1, 1]} : vector<4x16x32xf32> to vector<1x16x32xf32>
    %32 = vector.shape_cast %31 : vector<1x16x32xf32> to vector<16x32xf32>
    %33 = vector.broadcast %30 : vector<1x32xf32> to vector<16x32xf32>
    %34 = arith.addf %33, %32 : vector<16x32xf32>
    %35 = vector.extract_strided_slice %28 {offsets = [1, 0, 0], sizes = [1, 16, 32], strides = [1, 1, 1]} : vector<4x16x32xf32> to vector<1x16x32xf32>
    %36 = vector.shape_cast %35 : vector<1x16x32xf32> to vector<16x32xf32>
    %37 = arith.addf %34, %36 : vector<16x32xf32>
    %38 = vector.extract_strided_slice %28 {offsets = [2, 0, 0], sizes = [1, 16, 32], strides = [1, 1, 1]} : vector<4x16x32xf32> to vector<1x16x32xf32>
    %39 = vector.shape_cast %38 : vector<1x16x32xf32> to vector<16x32xf32>
    %40 = arith.addf %37, %39 : vector<16x32xf32>
    %41 = vector.extract_strided_slice %28 {offsets = [3, 0, 0], sizes = [1, 16, 32], strides = [1, 1, 1]} : vector<4x16x32xf32> to vector<1x16x32xf32>
    %42 = vector.shape_cast %41 : vector<1x16x32xf32> to vector<16x32xf32>
    %43 = arith.addf %40, %42 : vector<16x32xf32>
    %44 = arith.addf %43, %0 : vector<16x32xf32>
    %c0_30 = arith.constant 0 : index
    %c0_31 = arith.constant 0 : index
    %c0_32 = arith.constant 0 : index
    %45 = vector.load %arg7[%c0_30, %c0_31, %c0_32] : memref<2x1x32xf32, #tpu.memory_space<vmem>>, vector<1x1x32xf32>
    %46 = vector.shape_cast %45 : vector<1x1x32xf32> to vector<1x32xf32>
    %c0_33 = arith.constant 0 : index
    %c0_34 = arith.constant 0 : index
    %c0_35 = arith.constant 0 : index
    %47 = vector.load %arg8[%c0_33, %c0_34, %c0_35] : memref<2x1x32xf32, #tpu.memory_space<vmem>>, vector<1x1x32xf32>
    %48 = vector.shape_cast %47 : vector<1x1x32xf32> to vector<1x32xf32>
    %cst_36 = arith.constant dense<0.000000e+00> : vector<16xf32>
    %49 = vector.multi_reduction <add>, %44, %cst_36 [1] : vector<16x32xf32> to vector<16xf32>
    %50 = vector.shape_cast %49 : vector<16xf32> to vector<16x1xf32>
    %cst_37 = arith.constant 3.200000e+01 : f32
    %51 = vector.broadcast %cst_37 : f32 to vector<16x1xf32>
    %52 = arith.divf %50, %51 : vector<16x1xf32>
    %53 = vector.broadcast %52 : vector<16x1xf32> to vector<16x32xf32>
    %54 = arith.subf %44, %53 : vector<16x32xf32>
    %55 = arith.mulf %54, %54 : vector<16x32xf32>
    %cst_38 = arith.constant dense<0.000000e+00> : vector<16xf32>
    %56 = vector.multi_reduction <add>, %55, %cst_38 [1] : vector<16x32xf32> to vector<16xf32>
    %57 = vector.shape_cast %56 : vector<16xf32> to vector<16x1xf32>
    %cst_39 = arith.constant 3.200000e+01 : f32
    %58 = vector.broadcast %cst_39 : f32 to vector<16x1xf32>
    %59 = arith.divf %57, %58 : vector<16x1xf32>
    %60 = vector.broadcast %52 : vector<16x1xf32> to vector<16x32xf32>
    %61 = arith.subf %44, %60 : vector<16x32xf32>
    %cst_40 = arith.constant 9.99999974E-6 : f32
    %62 = vector.broadcast %cst_40 : f32 to vector<16x1xf32>
    %63 = arith.addf %59, %62 : vector<16x1xf32>
    %64 = math.rsqrt %63 : vector<16x1xf32>
    %65 = vector.broadcast %64 : vector<16x1xf32> to vector<16x32xf32>
    %66 = arith.mulf %61, %65 : vector<16x32xf32>
    %67 = vector.broadcast %46 : vector<1x32xf32> to vector<16x32xf32>
    %68 = arith.mulf %66, %67 : vector<16x32xf32>
    %69 = vector.broadcast %48 : vector<1x32xf32> to vector<16x32xf32>
    %70 = arith.addf %68, %69 : vector<16x32xf32>
    %c0_41 = arith.constant 0 : index
    %c0_42 = arith.constant 0 : index
    %c0_43 = arith.constant 0 : index
    %71 = vector.load %arg11[%c0_41, %c0_42, %c0_43] : memref<2x32x64xf32, #tpu.memory_space<vmem>>, vector<1x32x64xf32>
    %72 = vector.shape_cast %71 : vector<1x32x64xf32> to vector<32x64xf32>
    %cst_44 = arith.constant dense<0.000000e+00> : vector<16x64xf32>
    %73 = tpu.matmul %70, %72, %cst_44 {dimension_numbers = #tpu.dot_dimension_numbers<[1], [0], [0], [1], [0, 0, 1, 1], [], []>} : vector<16x32xf32>, vector<32x64xf32>, vector<16x64xf32> -> vector<16x64xf32>
    %c0_45 = arith.constant 0 : index
    %c0_46 = arith.constant 0 : index
    %c0_47 = arith.constant 0 : index
    %74 = vector.load %arg12[%c0_45, %c0_46, %c0_47] : memref<2x1x64xf32, #tpu.memory_space<vmem>>, vector<1x1x64xf32>
    %75 = vector.shape_cast %74 : vector<1x1x64xf32> to vector<1x64xf32>
    %76 = vector.broadcast %75 : vector<1x64xf32> to vector<16x64xf32>
    %77 = arith.addf %73, %76 : vector<16x64xf32>
    %cst_48 = arith.constant 0.000000e+00 : f32
    %78 = vector.broadcast %cst_48 : f32 to vector<16x64xf32>
    %79 = arith.maximumf %77, %78 : vector<16x64xf32>
    %c0_49 = arith.constant 0 : index
    %c0_50 = arith.constant 0 : index
    %c0_51 = arith.constant 0 : index
    %80 = vector.load %arg13[%c0_49, %c0_50, %c0_51] : memref<2x64x32xf32, #tpu.memory_space<vmem>>, vector<1x64x32xf32>
    %81 = vector.shape_cast %80 : vector<1x64x32xf32> to vector<64x32xf32>
    %cst_52 = arith.constant dense<0.000000e+00> : vector<16x32xf32>
    %82 = tpu.matmul %79, %81, %cst_52 {dimension_numbers = #tpu.dot_dimension_numbers<[1], [0], [0], [1], [0, 0, 1, 1], [], []>} : vector<16x64xf32>, vector<64x32xf32>, vector<16x32xf32> -> vector<16x32xf32>
    %c0_53 = arith.constant 0 : index
    %c0_54 = arith.constant 0 : index
    %c0_55 = arith.constant 0 : index
    %83 = vector.load %arg14[%c0_53, %c0_54, %c0_55] : memref<2x1x32xf32, #tpu.memory_space<vmem>>, vector<1x1x32xf32>
    %84 = vector.shape_cast %83 : vector<1x1x32xf32> to vector<1x32xf32>
    %85 = vector.broadcast %84 : vector<1x32xf32> to vector<16x32xf32>
    %86 = arith.addf %82, %85 : vector<16x32xf32>
    %87 = arith.addf %86, %70 : vector<16x32xf32>
    %c0_56 = arith.constant 0 : index
    %c0_57 = arith.constant 0 : index
    %c0_58 = arith.constant 0 : index
    %88 = vector.load %arg9[%c0_56, %c0_57, %c0_58] : memref<2x1x32xf32, #tpu.memory_space<vmem>>, vector<1x1x32xf32>
    %89 = vector.shape_cast %88 : vector<1x1x32xf32> to vector<1x32xf32>
    %c0_59 = arith.constant 0 : index
    %c0_60 = arith.constant 0 : index
    %c0_61 = arith.constant 0 : index
    %90 = vector.load %arg10[%c0_59, %c0_60, %c0_61] : memref<2x1x32xf32, #tpu.memory_space<vmem>>, vector<1x1x32xf32>
    %91 = vector.shape_cast %90 : vector<1x1x32xf32> to vector<1x32xf32>
    %cst_62 = arith.constant dense<0.000000e+00> : vector<16xf32>
    %92 = vector.multi_reduction <add>, %87, %cst_62 [1] : vector<16x32xf32> to vector<16xf32>
    %93 = vector.shape_cast %92 : vector<16xf32> to vector<16x1xf32>
    %cst_63 = arith.constant 3.200000e+01 : f32
    %94 = vector.broadcast %cst_63 : f32 to vector<16x1xf32>
    %95 = arith.divf %93, %94 : vector<16x1xf32>
    %96 = vector.broadcast %95 : vector<16x1xf32> to vector<16x32xf32>
    %97 = arith.subf %87, %96 : vector<16x32xf32>
    %98 = arith.mulf %97, %97 : vector<16x32xf32>
    %cst_64 = arith.constant dense<0.000000e+00> : vector<16xf32>
    %99 = vector.multi_reduction <add>, %98, %cst_64 [1] : vector<16x32xf32> to vector<16xf32>
    %100 = vector.shape_cast %99 : vector<16xf32> to vector<16x1xf32>
    %cst_65 = arith.constant 3.200000e+01 : f32
    %101 = vector.broadcast %cst_65 : f32 to vector<16x1xf32>
    %102 = arith.divf %100, %101 : vector<16x1xf32>
    %103 = vector.broadcast %95 : vector<16x1xf32> to vector<16x32xf32>
    %104 = arith.subf %87, %103 : vector<16x32xf32>
    %cst_66 = arith.constant 9.99999974E-6 : f32
    %105 = vector.broadcast %cst_66 : f32 to vector<16x1xf32>
    %106 = arith.addf %102, %105 : vector<16x1xf32>
    %107 = math.rsqrt %106 : vector<16x1xf32>
    %108 = vector.broadcast %107 : vector<16x1xf32> to vector<16x32xf32>
    %109 = arith.mulf %104, %108 : vector<16x32xf32>
    %110 = vector.broadcast %89 : vector<1x32xf32> to vector<16x32xf32>
    %111 = arith.mulf %109, %110 : vector<16x32xf32>
    %112 = vector.broadcast %91 : vector<1x32xf32> to vector<16x32xf32>
    %113 = arith.addf %111, %112 : vector<16x32xf32>
    %114 = vector.shape_cast %113 : vector<16x32xf32> to vector<1x16x32xf32>
    %115 = vector.shape_cast %114 : vector<1x16x32xf32> to vector<1x16x32xf32>
    %116 = vector.broadcast %115 : vector<1x16x32xf32> to vector<4x16x32xf32>
    %c1 = arith.constant 1 : index
    %c0_67 = arith.constant 0 : index
    %c0_68 = arith.constant 0 : index
    %c0_69 = arith.constant 0 : index
    %117 = vector.load %arg2[%c1, %c0_67, %c0_68, %c0_69] : memref<2x4x32x8xf32, #tpu.memory_space<vmem>>, vector<1x4x32x8xf32>
    %118 = vector.shape_cast %117 : vector<1x4x32x8xf32> to vector<4x32x8xf32>
    "tpu.trace_start"() <{level = 10 : i32, message = "hre,hed->hrd"}> : () -> ()
    %cst_70 = arith.constant dense<0.000000e+00> : vector<4x16x8xf32>
    %119 = tpu.matmul %116, %118, %cst_70 {dimension_numbers = #tpu.dot_dimension_numbers<[2], [1], [1], [2], [0, 0, 0, 1, 1, 2], [0], [0]>} : vector<4x16x32xf32>, vector<4x32x8xf32>, vector<4x16x8xf32> -> vector<4x16x8xf32>
    "tpu.trace_stop"() : () -> ()
    %c1_71 = arith.constant 1 : index
    %c0_72 = arith.constant 0 : index
    %c0_73 = arith.constant 0 : index
    %c0_74 = arith.constant 0 : index
    %120 = vector.load %arg3[%c1_71, %c0_72, %c0_73, %c0_74] : memref<2x4x32x8xf32, #tpu.memory_space<vmem>>, vector<1x4x32x8xf32>
    %121 = vector.shape_cast %120 : vector<1x4x32x8xf32> to vector<4x32x8xf32>
    "tpu.trace_start"() <{level = 10 : i32, message = "hre,hed->hrd"}> : () -> ()
    %cst_75 = arith.constant dense<0.000000e+00> : vector<4x16x8xf32>
    %122 = tpu.matmul %116, %121, %cst_75 {dimension_numbers = #tpu.dot_dimension_numbers<[2], [1], [1], [2], [0, 0, 0, 1, 1, 2], [0], [0]>} : vector<4x16x32xf32>, vector<4x32x8xf32>, vector<4x16x8xf32> -> vector<4x16x8xf32>
    "tpu.trace_stop"() : () -> ()
    %c1_76 = arith.constant 1 : index
    %c0_77 = arith.constant 0 : index
    %c0_78 = arith.constant 0 : index
    %c0_79 = arith.constant 0 : index
    %123 = vector.load %arg4[%c1_76, %c0_77, %c0_78, %c0_79] : memref<2x4x32x8xf32, #tpu.memory_space<vmem>>, vector<1x4x32x8xf32>
    %124 = vector.shape_cast %123 : vector<1x4x32x8xf32> to vector<4x32x8xf32>
    "tpu.trace_start"() <{level = 10 : i32, message = "hre,hed->hrd"}> : () -> ()
    %cst_80 = arith.constant dense<0.000000e+00> : vector<4x16x8xf32>
    %125 = tpu.matmul %116, %124, %cst_80 {dimension_numbers = #tpu.dot_dimension_numbers<[2], [1], [1], [2], [0, 0, 0, 1, 1, 2], [0], [0]>} : vector<4x16x32xf32>, vector<4x32x8xf32>, vector<4x16x8xf32> -> vector<4x16x8xf32>
    "tpu.trace_stop"() : () -> ()
    "tpu.trace_start"() <{level = 10 : i32, message = "hqd,hkd->hqk"}> : () -> ()
    %cst_81 = arith.constant dense<0.000000e+00> : vector<4x16x16xf32>
    %126 = tpu.matmul %119, %122, %cst_81 {dimension_numbers = #tpu.dot_dimension_numbers<[2], [2], [1], [1], [0, 0, 0, 1, 1, 1], [0], [0]>} : vector<4x16x8xf32>, vector<4x16x8xf32>, vector<4x16x16xf32> -> vector<4x16x16xf32>
    "tpu.trace_stop"() : () -> ()
    %127 = arith.addf %126, %1 : vector<4x16x16xf32>
    %cst_82 = arith.constant dense<0xFF800000> : vector<4x16xf32>
    %128 = vector.multi_reduction <maximumf>, %127, %cst_82 [2] : vector<4x16x16xf32> to vector<4x16xf32>
    %129 = vector.shape_cast %128 : vector<4x16xf32> to vector<4x16x1xf32>
    %130 = vector.broadcast %129 : vector<4x16x1xf32> to vector<4x16x16xf32>
    %131 = arith.subf %127, %130 : vector<4x16x16xf32>
    %132 = math.exp %131 : vector<4x16x16xf32>
    %cst_83 = arith.constant dense<0.000000e+00> : vector<4x16xf32>
    %133 = vector.multi_reduction <add>, %132, %cst_83 [2] : vector<4x16x16xf32> to vector<4x16xf32>
    %134 = vector.shape_cast %133 : vector<4x16xf32> to vector<4x16x1xf32>
    %135 = vector.broadcast %134 : vector<4x16x1xf32> to vector<4x16x16xf32>
    %136 = arith.divf %132, %135 : vector<4x16x16xf32>
    "tpu.trace_start"() <{level = 10 : i32, message = "hqk,hkd->hqd"}> : () -> ()
    %cst_84 = arith.constant dense<0.000000e+00> : vector<4x16x8xf32>
    %137 = tpu.matmul %136, %125, %cst_84 {dimension_numbers = #tpu.dot_dimension_numbers<[2], [1], [1], [2], [0, 0, 0, 1, 1, 2], [0], [0]>} : vector<4x16x16xf32>, vector<4x16x8xf32>, vector<4x16x8xf32> -> vector<4x16x8xf32>
    "tpu.trace_stop"() : () -> ()
    %c1_85 = arith.constant 1 : index
    %c0_86 = arith.constant 0 : index
    %c0_87 = arith.constant 0 : index
    %c0_88 = arith.constant 0 : index
    %138 = vector.load %arg5[%c1_85, %c0_86, %c0_87, %c0_88] : memref<2x4x8x32xf32, #tpu.memory_space<vmem>>, vector<1x4x8x32xf32>
    %139 = vector.shape_cast %138 : vector<1x4x8x32xf32> to vector<4x8x32xf32>
    "tpu.trace_start"() <{level = 10 : i32, message = "hrd,hde->hre"}> : () -> ()
    %cst_89 = arith.constant dense<0.000000e+00> : vector<4x16x32xf32>
    %140 = tpu.matmul %137, %139, %cst_89 {dimension_numbers = #tpu.dot_dimension_numbers<[2], [1], [1], [2], [0, 0, 0, 1, 1, 2], [0], [0]>} : vector<4x16x8xf32>, vector<4x8x32xf32>, vector<4x16x32xf32> -> vector<4x16x32xf32>
    "tpu.trace_stop"() : () -> ()
    %c1_90 = arith.constant 1 : index
    %c0_91 = arith.constant 0 : index
    %c0_92 = arith.constant 0 : index
    %141 = vector.load %arg6[%c1_90, %c0_91, %c0_92] : memref<2x1x32xf32, #tpu.memory_space<vmem>>, vector<1x1x32xf32>
    %142 = vector.shape_cast %141 : vector<1x1x32xf32> to vector<1x32xf32>
    %143 = vector.extract_strided_slice %140 {offsets = [0, 0, 0], sizes = [1, 16, 32], strides = [1, 1, 1]} : vector<4x16x32xf32> to vector<1x16x32xf32>
    %144 = vector.shape_cast %143 : vector<1x16x32xf32> to vector<16x32xf32>
    %145 = vector.broadcast %142 : vector<1x32xf32> to vector<16x32xf32>
    %146 = arith.addf %145, %144 : vector<16x32xf32>
    %147 = vector.extract_strided_slice %140 {offsets = [1, 0, 0], sizes = [1, 16, 32], strides = [1, 1, 1]} : vector<4x16x32xf32> to vector<1x16x32xf32>
    %148 = vector.shape_cast %147 : vector<1x16x32xf32> to vector<16x32xf32>
    %149 = arith.addf %146, %148 : vector<16x32xf32>
    %150 = vector.extract_strided_slice %140 {offsets = [2, 0, 0], sizes = [1, 16, 32], strides = [1, 1, 1]} : vector<4x16x32xf32> to vector<1x16x32xf32>
    %151 = vector.shape_cast %150 : vector<1x16x32xf32> to vector<16x32xf32>
    %152 = arith.addf %149, %151 : vector<16x32xf32>
    %153 = vector.extract_strided_slice %140 {offsets = [3, 0, 0], sizes = [1, 16, 32], strides = [1, 1, 1]} : vector<4x16x32xf32> to vector<1x16x32xf32>
    %154 = vector.shape_cast %153 : vector<1x16x32xf32> to vector<16x32xf32>
    %155 = arith.addf %152, %154 : vector<16x32xf32>
    %156 = arith.addf %155, %113 : vector<16x32xf32>
    %c1_93 = arith.constant 1 : index
    %c0_94 = arith.constant 0 : index
    %c0_95 = arith.constant 0 : index
    %157 = vector.load %arg7[%c1_93, %c0_94, %c0_95] : memref<2x1x32xf32, #tpu.memory_space<vmem>>, vector<1x1x32xf32>
    %158 = vector.shape_cast %157 : vector<1x1x32xf32> to vector<1x32xf32>
    %c1_96 = arith.constant 1 : index
    %c0_97 = arith.constant 0 : index
    %c0_98 = arith.constant 0 : index
    %159 = vector.load %arg8[%c1_96, %c0_97, %c0_98] : memref<2x1x32xf32, #tpu.memory_space<vmem>>, vector<1x1x32xf32>
    %160 = vector.shape_cast %159 : vector<1x1x32xf32> to vector<1x32xf32>
    %cst_99 = arith.constant dense<0.000000e+00> : vector<16xf32>
    %161 = vector.multi_reduction <add>, %156, %cst_99 [1] : vector<16x32xf32> to vector<16xf32>
    %162 = vector.shape_cast %161 : vector<16xf32> to vector<16x1xf32>
    %cst_100 = arith.constant 3.200000e+01 : f32
    %163 = vector.broadcast %cst_100 : f32 to vector<16x1xf32>
    %164 = arith.divf %162, %163 : vector<16x1xf32>
    %165 = vector.broadcast %164 : vector<16x1xf32> to vector<16x32xf32>
    %166 = arith.subf %156, %165 : vector<16x32xf32>
    %167 = arith.mulf %166, %166 : vector<16x32xf32>
    %cst_101 = arith.constant dense<0.000000e+00> : vector<16xf32>
    %168 = vector.multi_reduction <add>, %167, %cst_101 [1] : vector<16x32xf32> to vector<16xf32>
    %169 = vector.shape_cast %168 : vector<16xf32> to vector<16x1xf32>
    %cst_102 = arith.constant 3.200000e+01 : f32
    %170 = vector.broadcast %cst_102 : f32 to vector<16x1xf32>
    %171 = arith.divf %169, %170 : vector<16x1xf32>
    %172 = vector.broadcast %164 : vector<16x1xf32> to vector<16x32xf32>
    %173 = arith.subf %156, %172 : vector<16x32xf32>
    %cst_103 = arith.constant 9.99999974E-6 : f32
    %174 = vector.broadcast %cst_103 : f32 to vector<16x1xf32>
    %175 = arith.addf %171, %174 : vector<16x1xf32>
    %176 = math.rsqrt %175 : vector<16x1xf32>
    %177 = vector.broadcast %176 : vector<16x1xf32> to vector<16x32xf32>
    %178 = arith.mulf %173, %177 : vector<16x32xf32>
    %179 = vector.broadcast %158 : vector<1x32xf32> to vector<16x32xf32>
    %180 = arith.mulf %178, %179 : vector<16x32xf32>
    %181 = vector.broadcast %160 : vector<1x32xf32> to vector<16x32xf32>
    %182 = arith.addf %180, %181 : vector<16x32xf32>
    %c1_104 = arith.constant 1 : index
    %c0_105 = arith.constant 0 : index
    %c0_106 = arith.constant 0 : index
    %183 = vector.load %arg11[%c1_104, %c0_105, %c0_106] : memref<2x32x64xf32, #tpu.memory_space<vmem>>, vector<1x32x64xf32>
    %184 = vector.shape_cast %183 : vector<1x32x64xf32> to vector<32x64xf32>
    %cst_107 = arith.constant dense<0.000000e+00> : vector<16x64xf32>
    %185 = tpu.matmul %182, %184, %cst_107 {dimension_numbers = #tpu.dot_dimension_numbers<[1], [0], [0], [1], [0, 0, 1, 1], [], []>} : vector<16x32xf32>, vector<32x64xf32>, vector<16x64xf32> -> vector<16x64xf32>
    %c1_108 = arith.constant 1 : index
    %c0_109 = arith.constant 0 : index
    %c0_110 = arith.constant 0 : index
    %186 = vector.load %arg12[%c1_108, %c0_109, %c0_110] : memref<2x1x64xf32, #tpu.memory_space<vmem>>, vector<1x1x64xf32>
    %187 = vector.shape_cast %186 : vector<1x1x64xf32> to vector<1x64xf32>
    %188 = vector.broadcast %187 : vector<1x64xf32> to vector<16x64xf32>
    %189 = arith.addf %185, %188 : vector<16x64xf32>
    %cst_111 = arith.constant 0.000000e+00 : f32
    %190 = vector.broadcast %cst_111 : f32 to vector<16x64xf32>
    %191 = arith.maximumf %189, %190 : vector<16x64xf32>
    %c1_112 = arith.constant 1 : index
    %c0_113 = arith.constant 0 : index
    %c0_114 = arith.constant 0 : index
    %192 = vector.load %arg13[%c1_112, %c0_113, %c0_114] : memref<2x64x32xf32, #tpu.memory_space<vmem>>, vector<1x64x32xf32>
    %193 = vector.shape_cast %192 : vector<1x64x32xf32> to vector<64x32xf32>
    %cst_115 = arith.constant dense<0.000000e+00> : vector<16x32xf32>
    %194 = tpu.matmul %191, %193, %cst_115 {dimension_numbers = #tpu.dot_dimension_numbers<[1], [0], [0], [1], [0, 0, 1, 1], [], []>} : vector<16x64xf32>, vector<64x32xf32>, vector<16x32xf32> -> vector<16x32xf32>
    %c1_116 = arith.constant 1 : index
    %c0_117 = arith.constant 0 : index
    %c0_118 = arith.constant 0 : index
    %195 = vector.load %arg14[%c1_116, %c0_117, %c0_118] : memref<2x1x32xf32, #tpu.memory_space<vmem>>, vector<1x1x32xf32>
    %196 = vector.shape_cast %195 : vector<1x1x32xf32> to vector<1x32xf32>
    %197 = vector.broadcast %196 : vector<1x32xf32> to vector<16x32xf32>
    %198 = arith.addf %194, %197 : vector<16x32xf32>
    %199 = arith.addf %198, %182 : vector<16x32xf32>
    %c1_119 = arith.constant 1 : index
    %c0_120 = arith.constant 0 : index
    %c0_121 = arith.constant 0 : index
    %200 = vector.load %arg9[%c1_119, %c0_120, %c0_121] : memref<2x1x32xf32, #tpu.memory_space<vmem>>, vector<1x1x32xf32>
    %201 = vector.shape_cast %200 : vector<1x1x32xf32> to vector<1x32xf32>
    %c1_122 = arith.constant 1 : index
    %c0_123 = arith.constant 0 : index
    %c0_124 = arith.constant 0 : index
    %202 = vector.load %arg10[%c1_122, %c0_123, %c0_124] : memref<2x1x32xf32, #tpu.memory_space<vmem>>, vector<1x1x32xf32>
    %203 = vector.shape_cast %202 : vector<1x1x32xf32> to vector<1x32xf32>
    %cst_125 = arith.constant dense<0.000000e+00> : vector<16xf32>
    %204 = vector.multi_reduction <add>, %199, %cst_125 [1] : vector<16x32xf32> to vector<16xf32>
    %205 = vector.shape_cast %204 : vector<16xf32> to vector<16x1xf32>
    %cst_126 = arith.constant 3.200000e+01 : f32
    %206 = vector.broadcast %cst_126 : f32 to vector<16x1xf32>
    %207 = arith.divf %205, %206 : vector<16x1xf32>
    %208 = vector.broadcast %207 : vector<16x1xf32> to vector<16x32xf32>
    %209 = arith.subf %199, %208 : vector<16x32xf32>
    %210 = arith.mulf %209, %209 : vector<16x32xf32>
    %cst_127 = arith.constant dense<0.000000e+00> : vector<16xf32>
    %211 = vector.multi_reduction <add>, %210, %cst_127 [1] : vector<16x32xf32> to vector<16xf32>
    %212 = vector.shape_cast %211 : vector<16xf32> to vector<16x1xf32>
    %cst_128 = arith.constant 3.200000e+01 : f32
    %213 = vector.broadcast %cst_128 : f32 to vector<16x1xf32>
    %214 = arith.divf %212, %213 : vector<16x1xf32>
    %215 = vector.broadcast %207 : vector<16x1xf32> to vector<16x32xf32>
    %216 = arith.subf %199, %215 : vector<16x32xf32>
    %cst_129 = arith.constant 9.99999974E-6 : f32
    %217 = vector.broadcast %cst_129 : f32 to vector<16x1xf32>
    %218 = arith.addf %214, %217 : vector<16x1xf32>
    %219 = math.rsqrt %218 : vector<16x1xf32>
    %220 = vector.broadcast %219 : vector<16x1xf32> to vector<16x32xf32>
    %221 = arith.mulf %216, %220 : vector<16x32xf32>
    %222 = vector.broadcast %201 : vector<1x32xf32> to vector<16x32xf32>
    %223 = arith.mulf %221, %222 : vector<16x32xf32>
    %224 = vector.broadcast %203 : vector<1x32xf32> to vector<16x32xf32>
    %225 = arith.addf %223, %224 : vector<16x32xf32>
    %c0_130 = arith.constant 0 : index
    %c0_131 = arith.constant 0 : index
    %226 = vector.load %arg15[%c0_130, %c0_131] : memref<16x32xf32, #tpu.memory_space<vmem>>, vector<16x32xf32>
    tpu.vector_store %arg15[%c0_130, %c0_131], %225 {strides = array<i32>} : memref<16x32xf32, #tpu.memory_space<vmem>>, vector<16x32xf32>,
    return
  }
}

</mosaic_0001>

<bundles_post_ra>
// kernel: tpu_custom_call.1
= control target key start
LH: loop header
LB: loop body
LE: loop exit
PB: predicated region body
PF: predicated region fallthrough
CT: control target
= control target key end

     0   :  { %20 = vsyncpa [#allocation3], 0  ;;  %s7067_s0 = inlined_call_operand.hbm [shape: f32[16,32], index: 0, kind: input, shape index: {}, may-alias: {0,15}]   ;;  %s7068_s1 = inlined_call_operand.vmem [shape: f32[4,16,16], index: 1, kind: input, shape index: {}]   ;;  %s7069_s2 = inlined_call_operand.vmem [shape: f32[2,4,32,8], index: 2, kind: input, shape index: {}]   ;;  %s7070_s3 = inlined_call_operand.vmem [shape: f32[2,4,32,8], index: 3, kind: input, shape index: {}]   ;;  %s7071_s4 = inlined_call_operand.vmem [shape: f32[2,4,32,8], index: 4, kind: input, shape index: {}]   ;;  %s7072_s5 = inlined_call_operand.vmem [shape: f32[2,4,8,32], index: 5, kind: input, shape index: {}]   ;;  %s7073_s6 = inlined_call_operand.vmem [shape: f32[2,1,32], index: 6, kind: input, shape index: {}]   ;;  %s7074_s7 = inlined_call_operand.vmem [shape: f32[2,1,32], index: 7, kind: input, shape index: {}]   ;;  %s7075_s8 = inlined_call_operand.vmem [shape: f32[2,1,32], index: 8, kind: input, shape index: {}]   ;;  %s7076_s9 = inlined_call_operand.vmem [shape: f32[2,1,32], index: 9, kind: input, shape index: {}]   ;;  %s7077_s10 = inlined_call_operand.vmem [shape: f32[2,1,32], index: 10, kind: input, shape index: {}]   ;;  %s7078_s11 = inlined_call_operand.vmem [shape: f32[2,32,64], index: 11, kind: input, shape index: {}]   ;;  %s7079_s12 = inlined_call_operand.vmem [shape: f32[2,1,64], index: 12, kind: input, shape index: {}]   ;;  %s7080_s13 = inlined_call_operand.vmem [shape: f32[2,64,32], index: 13, kind: input, shape index: {}]   ;;  %s7081_s14 = inlined_call_operand.vmem [shape: f32[2,1,32], index: 14, kind: input, shape index: {}]   ;;  %s7082_s15 = inlined_call_operand.hbm [shape: f32[16,32], index: 15, kind: output, shape index: {}, may-alias: {0,15}]  }
   0x1   :  { %21 = vsyncpa [#allocation4], 0  ;;  %s6203_s18 = smov [#allocation2]   ;;  %s6155_s22 = scalar_lea.hbm %s7067_s0, 256 }
   0x2   :  { %s27_s19 = sshll.u32 %s6203_s18, 4  ;;  %p6156_p0 = scmp.ne.s32.totalorder %s7067_s0, %s6155_s22  ;;  %s28_s19 = int_to_ptr.vmem [resolvable:$true] %s27_s19 }
   0x3   :  { %p6159_p1 = scmp.lt.u32.totalorder %s6155_s22, %s7067_s0 }
   0x5   :  { %p6161_p2 = pnand %p6159_p1, %p6156_p0 }
   0x7   :  { %6164 = shalt.err (!%p6161_p2)
}
   0x8   :  { %s6165_s27 = scalar_lea.vmem %s28_s19, 256  ;;  %p6170_p4 = scmp.lt.s32.totalorder %s28_s19, %s28_s19 }
   0x9   :  { %p6166_p3 = scmp.ne.s32.totalorder %s28_s19, %s6165_s27  ;;  %p6171_p5 = scmp.lt.s32.totalorder %s6165_s27, %s6165_s27 }
   0xb   :  { %p6172_p6 = por %p6171_p5, %p6170_p4 }
   0xd   :  { %p6173_p7 = pnand %p6172_p6, %p6166_p3 }
   0xf   :  { %6176 = shalt.err (!%p6173_p7)
}
  0x10   :  { %s6204_s28 = smov 128   ;;  %s6205_s29 = smov 8  }
  0x11   :  { %33 = dma.hbm_to_vmem [thread:$0]  %s7067_s0, 256, %s28_s19, [#allocation3], %s6204_s28, %s6204_s28, %s6205_s29  }
  0x12   :  { %6199 = dma.done.wait [#allocation3], 256  }
  0x13   :  { %6200 = vsyncadd [#allocation3], 4294967040  ;;  %v75_v0 = vld [vmem:[%s7069_s2] sm:$0xff]  ;;  %v76_v1 = vld [vmem:[%s7069_s2 + $0x8] sm:$0xff]  ;;  %vm91_vm0 = vcmask 261120   ;;  %vm1030_vm1 = vcmask 64512  }
  0x14   :  { %v79_v2 = vld [vmem:[%s7069_s2 + $0x20] sm:$0xff]  ;;  %v5735_v3 = vpack.c.bf16 %v76_v1, %v75_v0  ;;  %v80_v4 = vld [vmem:[%s7069_s2 + $0x28] sm:$0xff]  ;;  %v77_v5 = vld [vmem:[%s7069_s2 + $0x10] sm:$0xff]  ;;  %vm1379_vm3 = vcmask 130048   ;;  %vm2291_vm4 = vcmask 523264  }
  0x15   :  { %v78_v6 = vld [vmem:[%s7069_s2 + $0x18] sm:$0xff]  ;;  %v5743_v7 = vpack.c.bf16 %v80_v4, %v79_v2  ;;  %v81_v9 = vld [vmem:[%s7069_s2 + $0x30] sm:$0xff]  ;;  %v6326_v11 = vld [vmem:[#allocation2] sm:$0xff] }
  0x16   :  { %v5739_v8 = vpack.c.bf16 %v78_v6, %v77_v5  ;;  %v82_v10 = vld [vmem:[%s7069_s2 + $0x38] sm:$0xff]  ;;  %5736 = vmatprep.subr.bf16.mxu0 %v5735_v3  ;;  %5267 = vmatprep.mubr.msk.f32.mxu0 %vm91_vm0, %v6326_v11  ;;  %v83_v13 = vld [vmem:[%s7069_s2 + $0x40] sm:$0xff]  ;;  %v84_v14 = vld [vmem:[%s7069_s2 + $0x48] sm:$0xff] }
  0x17   :  { %v5747_v12 = vpack.c.bf16 %v82_v10, %v81_v9  ;;  %5744 = vmatprep.subr.bf16.mxu1 %v5743_v7  ;;  %5738 = vmatpush3.bf16.msra.mxu0 %v5735_v3  ;;  %v87_v15 = vld [vmem:[%s7069_s2 + $0x60] sm:$0xff]  ;;  %v88_v16 = vld [vmem:[%s7069_s2 + $0x68] sm:$0xff]  ;;  %v5751_v17 = vpack.c.bf16 %v84_v14, %v83_v13  ;;  %v85_v19 = vld [vmem:[%s7069_s2 + $0x50] sm:$0xff] }
  0x18   :  { %5746 = vmatpush3.bf16.msra.mxu1 %v5743_v7  ;;  %5740 = vmatprep.subr.bf16.mxu0 %v5739_v8  ;;  %v5759_v18 = vpack.c.bf16 %v88_v16, %v87_v15  ;;  %v86_v20 = vld [vmem:[%s7069_s2 + $0x58] sm:$0xff]  ;;  %v89_v21 = vld [vmem:[%s7069_s2 + $0x70] sm:$0xff]  ;;  %v6356_v23 = vld [vmem:[#allocation2 + $0x8] sm:$0xff] }
  0x19   :  { %5748 = vmatprep.subr.bf16.mxu1 %v5747_v12  ;;  %5278 = vmatprep.mubr.msk.f32.mxu1 %vm91_vm0, %v6326_v11  ;;  %v90_v22 = vld [vmem:[%s7069_s2 + $0x78] sm:$0xff]  ;;  %v5755_v24 = vpack.c.bf16 %v86_v20, %v85_v19  ;;  %v398_v26 = vld [vmem:[%s7070_s3] sm:$0xff]  ;;  %v399_v27 = vld [vmem:[%s7070_s3 + $0x8] sm:$0xff] }
  0x1a   :  { %v5763_v25 = vpack.c.bf16 %v90_v22, %v89_v21  ;;  %v402_v28 = vld [vmem:[%s7070_s3 + $0x20] sm:$0xff]  ;;  %v403_v29 = vld [vmem:[%s7070_s3 + $0x28] sm:$0xff]  ;;  %v5767_v30 = vpack.c.bf16 %v399_v27, %v398_v26  ;;  %v400_v32 = vld [vmem:[%s7070_s3 + $0x10] sm:$0xff] }
  0x1b   :  { %5742 = vmatpush3.bf16.msra.mxu0 %v5739_v8  ;;  %v5775_v31 = vpack.c.bf16 %v403_v29, %v402_v28  ;;  %v401_v33 = vld [vmem:[%s7070_s3 + $0x18] sm:$0xff]  ;;  %v404_v34 = vld [vmem:[%s7070_s3 + $0x30] sm:$0xff]  ;;  %v406_v38 = vld [vmem:[%s7070_s3 + $0x40] sm:$0xff] }
  0x1c   :  { %5750 = vmatpush3.bf16.msra.mxu1 %v5747_v12  ;;  %5752 = vmatprep.subr.bf16.mxu0 %v5751_v17  ;;  %v405_v35 = vld [vmem:[%s7070_s3 + $0x38] sm:$0xff]  ;;  %v5771_v36 = vpack.c.bf16 %v401_v33, %v400_v32  ;;  %v407_v39 = vld [vmem:[%s7070_s3 + $0x48] sm:$0xff]  ;;  %v410_v40 = vld [vmem:[%s7070_s3 + $0x60] sm:$0xff] }
  0x1d   :  { %5760 = vmatprep.subr.bf16.mxu1 %v5759_v18  ;;  %v5779_v37 = vpack.c.bf16 %v405_v35, %v404_v34  ;;  %v411_v41 = vld [vmem:[%s7070_s3 + $0x68] sm:$0xff]  ;;  %v5783_v42 = vpack.c.bf16 %v407_v39, %v406_v38  ;;  %v408_v44 = vld [vmem:[%s7070_s3 + $0x50] sm:$0xff]  ;;  %v409_v45 = vld [vmem:[%s7070_s3 + $0x58] sm:$0xff] }
  0x1e   :  { %5268 = vmatmul.mubr.msk.f32.vlgmr.msra.gmra.mrb[0].mxu0 %vm91_vm0, %v6356_v23  ;;  %v5791_v43 = vpack.c.bf16 %v411_v41, %v410_v40  ;;  %v412_v46 = vld [vmem:[%s7070_s3 + $0x70] sm:$0xff]  ;;  %v413_v47 = vld [vmem:[%s7070_s3 + $0x78] sm:$0xff]  ;;  %v5787_v48 = vpack.c.bf16 %v409_v45, %v408_v44  ;;  %v714_v50 = vld [vmem:[%s7071_s4] sm:$0xff] }
  0x1f   :  { %5279 = vmatmul.mubr.msk.f32.vlgmr.msra.gmra.mrb[0].mxu1 %vm91_vm0, %v6356_v23  ;;  %5754 = vmatpush3.bf16.msra.mxu0 %v5751_v17  ;;  %v5795_v49 = vpack.c.bf16 %v413_v47, %v412_v46  ;;  %v715_v51 = vld [vmem:[%s7071_s4 + $0x8] sm:$0xff]  ;;  %v718_v52 = vld [vmem:[%s7071_s4 + $0x20] sm:$0xff]  ;;  %v716_v55 = vld [vmem:[%s7071_s4 + $0x10] sm:$0xff] }
  0x20   :  { %5762 = vmatpush3.bf16.msra.mxu1 %v5759_v18  ;;  %5756 = vmatprep.subr.bf16.mxu0 %v5755_v24  ;;  %v719_v53 = vld [vmem:[%s7071_s4 + $0x28] sm:$0xff]  ;;  %v5799_v54 = vpack.c.bf16 %v715_v51, %v714_v50  ;;  %v717_v56 = vld [vmem:[%s7071_s4 + $0x18] sm:$0xff]  ;;  %v720_v58 = vld [vmem:[%s7071_s4 + $0x30] sm:$0xff] }
  0x21   :  { %5764 = vmatprep.subr.bf16.mxu1 %v5763_v25  ;;  %5289 = vmatprep.mubr.msk.f32.mxu0 %vm91_vm0, %v6326_v11  ;;  %v5807_v57 = vpack.c.bf16 %v719_v53, %v718_v52  ;;  %v721_v59 = vld [vmem:[%s7071_s4 + $0x38] sm:$0xff]  ;;  %v5803_v60 = vpack.c.bf16 %v717_v56, %v716_v55  ;;  %v722_v61 = vld [vmem:[%s7071_s4 + $0x40] sm:$0xff]  ;;  %v723_v62 = vld [vmem:[%s7071_s4 + $0x48] sm:$0xff] }
  0x22   :  { %5300 = vmatprep.mubr.msk.f32.mxu1 %vm91_vm0, %v6326_v11  ;;  %v5811_v63 = vpack.c.bf16 %v721_v59, %v720_v58  ;;  %v5815_v0 = vpack.c.bf16 %v723_v62, %v722_v61  ;;  %v724_v1 = vld [vmem:[%s7071_s4 + $0x50] sm:$0xff]  ;;  %v725_v2 = vld [vmem:[%s7071_s4 + $0x58] sm:$0xff]  ;;  %v726_v4 = vld [vmem:[%s7071_s4 + $0x60] sm:$0xff] }
  0x23   :  { %5758 = vmatpush3.bf16.msra.mxu0 %v5755_v24  ;;  %v5819_v3 = vpack.c.bf16 %v725_v2, %v724_v1  ;;  %v727_v5 = vld [vmem:[%s7071_s4 + $0x68] sm:$0xff]  ;;  %v728_v7 = vld [vmem:[%s7071_s4 + $0x70] sm:$0xff]  ;;  %v729_v8 = vld [vmem:[%s7071_s4 + $0x78] sm:$0xff] }
  0x24   :  { %5766 = vmatpush3.bf16.msra.mxu1 %v5763_v25  ;;  %5768 = vmatprep.subr.bf16.mxu0 %v5767_v30  ;;  %v5823_v6 = vpack.c.bf16 %v727_v5, %v726_v4  ;;  %v5827_v9 = vpack.c.bf16 %v729_v8, %v728_v7  ;;  %vm6502_vm2 = vmpackc.low %vm1030_vm1, %vm1030_vm1  ;;  %v6536_v45 = vld [vmem:[%s7068_s1] sm:$0xff]  ;;  %v6541_v47 = vld [vmem:[%s7068_s1 + $0x10] sm:$0xff] }
  0x25   :  { %5776 = vmatprep.subr.bf16.mxu1 %v5775_v31  ;;  %v6551_v51 = vld [vmem:[%s7068_s1 + $0x18] sm:$0xff]  ;;  %v6562_v59 = vld [vmem:[%s7068_s1 + $0x28] sm:$0xff] }
  0x26   :  { %5290 = vmatmul.mubr.msk.f32.vlgmr.msra.gmra.mrb[2].mxu0 %vm91_vm0, %v6356_v23  ;;  %v6575_v1 = vld [vmem:[%s7068_s1 + $0x38] sm:$0xff] }
  0x27   :  { %5301 = vmatmul.mubr.msk.f32.vlgmr.msra.gmra.mrb[2].mxu1 %vm91_vm0, %v6356_v23  ;;  %5770 = vmatpush3.bf16.msra.mxu0 %v5767_v30 }
  0x28   :  { %5778 = vmatpush3.bf16.msra.mxu1 %v5775_v31  ;;  %5772 = vmatprep.subr.bf16.mxu0 %v5771_v36 }
  0x29   :  { %5780 = vmatprep.subr.bf16.mxu1 %v5779_v37  ;;  %5311 = vmatprep.mubr.msk.f32.mxu0 %vm91_vm0, %v6326_v11 }
  0x2a   :  { %5322 = vmatprep.mubr.msk.f32.mxu1 %vm91_vm0, %v6326_v11 }
  0x2b   :  { %5774 = vmatpush3.bf16.msra.mxu0 %v5771_v36 }
  0x2c   :  { %5782 = vmatpush3.bf16.msra.mxu1 %v5779_v37  ;;  %5784 = vmatprep.subr.bf16.mxu0 %v5783_v42 }
  0x2d   :  { %5792 = vmatprep.subr.bf16.mxu1 %v5791_v43 }
  0x2e   :  { %5312 = vmatmul.mubr.msk.f32.vlgmr.msra.gmra.mrb[4].mxu0 %vm91_vm0, %v6356_v23 }
  0x2f   :  { %5323 = vmatmul.mubr.msk.f32.vlgmr.msra.gmra.mrb[4].mxu1 %vm91_vm0, %v6356_v23  ;;  %5786 = vmatpush3.bf16.msra.mxu0 %v5783_v42 }
  0x30   :  { %5794 = vmatpush3.bf16.msra.mxu1 %v5791_v43  ;;  %5788 = vmatprep.subr.bf16.mxu0 %v5787_v48 }
  0x31   :  { %5796 = vmatprep.subr.bf16.mxu1 %v5795_v49  ;;  %5333 = vmatprep.mubr.msk.f32.mxu0 %vm91_vm0, %v6326_v11 }
  0x32   :  { %5344 = vmatprep.mubr.msk.f32.mxu1 %vm91_vm0, %v6326_v11 }
  0x33   :  { %5790 = vmatpush3.bf16.msra.mxu0 %v5787_v48  ;;  %v6546_v48 = vld [vmem:[%s7068_s1 + $0x8] sm:$0xff] }
  0x34   :  { %5798 = vmatpush3.bf16.msra.mxu1 %v5795_v49  ;;  %5800 = vmatprep.subr.bf16.mxu0 %v5799_v54 }
  0x35   :  { %5808 = vmatprep.subr.bf16.mxu1 %v5807_v57 }
  0x36   :  { %5334 = vmatmul.mubr.msk.f32.vlgmr.msra.gmra.mrb[6].mxu0 %vm91_vm0, %v6356_v23 }
  0x37   :  { %5345 = vmatmul.mubr.msk.f32.vlgmr.msra.gmra.mrb[6].mxu1 %vm91_vm0, %v6356_v23  ;;  %5802 = vmatpush3.bf16.msra.mxu0 %v5799_v54 }
  0x38   :  { %5804 = vmatprep.subr.bf16.mxu0 %v5803_v60  ;;  %5355 = vmatprep.mubr.msk.f32.mxu0 %vm91_vm0, %v6326_v11 }
  0x39   :  { %5810 = vmatpush3.bf16.msra.mxu1 %v5807_v57  ;;  %5366 = vmatprep.mubr.msk.f32.mxu1 %vm91_vm0, %v6326_v11 }
  0x3a   :  { %5812 = vmatprep.subr.bf16.mxu1 %v5811_v63 }
  0x3b   :  { %5806 = vmatpush3.bf16.msra.mxu0 %v5803_v60  ;;  %v6567_v60 = vld [vmem:[%s7068_s1 + $0x20] sm:$0xff] }
  0x3c   :  { %5816 = vmatprep.subr.bf16.mxu0 %v5815_v0 }
  0x3d   :  { %5814 = vmatpush3.bf16.msra.mxu1 %v5811_v63 }
  0x3e   :  { %5356 = vmatmul.mubr.msk.f32.vlgmr.msra.gmra.mrb[8].mxu0 %vm91_vm0, %v6356_v23  ;;  %5824 = vmatprep.subr.bf16.mxu1 %v5823_v6 }
  0x3f   :  { %5818 = vmatpush3.bf16.msra.mxu0 %v5815_v0  ;;  %5377 = vmatprep.mubr.msk.f32.mxu0 %vm91_vm0, %v6326_v11 }
  0x40   :  { %5820 = vmatprep.subr.bf16.mxu0 %v5819_v3  ;;  %5367 = vmatmul.mubr.msk.f32.vlgmr.msra.gmra.mrb[8].mxu1 %vm91_vm0, %v6356_v23 }
  0x41   :  { %5388 = vmatprep.mubr.msk.f32.mxu1 %vm91_vm0, %v6326_v11  ;;  %5826 = vmatpush3.bf16.msra.mxu1 %v5823_v6 }
  0x42   :  { %5828 = vmatprep.subr.bf16.mxu1 %v5827_v9 }
  0x43   :  { %5822 = vmatpush3.bf16.msra.mxu0 %v5819_v3  ;;  %v6580_v3 = vld [vmem:[%s7068_s1 + $0x30] sm:$0xff] }
  0x45   :  { %5830 = vmatpush3.bf16.msra.mxu1 %v5827_v9 }
  0x46   :  { %5378 = vmatmul.mubr.msk.f32.vlgmr.msra.gmra.mrb[10].mxu0 %vm91_vm0, %v6356_v23 }
  0x48   :  { %5389 = vmatmul.mubr.msk.f32.vlgmr.msra.gmra.mrb[10].mxu1 %vm91_vm0, %v6356_v23 }
  0xf1   :  { %v5269_v10 = vpop.f32.mrb[0].mxu0 }
  0xf2   :  { %v164_v12 = vpop.f32.mrb[1].mxu0  ;;  %v5280_v13 = vpop.f32.mrb[0].mxu1 }
  0xf3   :  { %5395 = vmatprep.mubr.msk.f32.mxu0 %vm1030_vm1, %v164_v12  ;;  %v239_v14 = vpop.f32.mrb[1].mxu1 }
  0xf4   :  { %5402 = vmatprep.mubr.msk.f32.mxu1 %vm1030_vm1, %v239_v14 }
  0xf9   :  { %v5291_v15 = vpop.f32.mrb[2].mxu0 }
  0xfa   :  { %v314_v16 = vpop.f32.mrb[3].mxu0  ;;  %v5302_v17 = vpop.f32.mrb[2].mxu1 }
  0xfb   :  { %v389_v18 = vpop.f32.mrb[3].mxu1 }
 0x101   :  { %v5313_v19 = vpop.f32.mrb[4].mxu0 }
 0x102   :  { %v5324_v20 = vpop.f32.mrb[4].mxu1  ;;  %v480_v21 = vpop.f32.mrb[5].mxu0 }
 0x103   :  { %v5831_v24 = vpack.c.bf16 %v5313_v19, %v480_v21  ;;  %v555_v25 = vpop.f32.mrb[5].mxu1 }
 0x104   :  { %v5837_v26 = vpack.c.bf16 %v5324_v20, %v555_v25 }
 0x105   :  { %5833 = vmatprep.subr.msk.bf16.mxu0 %vm6502_vm2, %v5831_v24 }
 0x106   :  { %5839 = vmatprep.subr.msk.bf16.mxu1 %vm6502_vm2, %v5837_v26  ;;  %5836 = vmatpush3.bf16.xpose.msk.msra.mxu0 %vm6502_vm2, %v5831_v24 }
 0x107   :  { %5842 = vmatpush3.bf16.xpose.msk.msra.mxu1 %vm6502_vm2, %v5837_v26 }
 0x109   :  { %v5335_v27 = vpop.f32.mrb[6].mxu0 }
 0x10a   :  { %v5346_v28 = vpop.f32.mrb[6].mxu1  ;;  %v630_v29 = vpop.f32.mrb[7].mxu0 }
 0x10b   :  { %v5843_v30 = vpack.c.bf16 %v5335_v27, %v630_v29  ;;  %v705_v31 = vpop.f32.mrb[7].mxu1 }
 0x10c   :  { %v5849_v32 = vpack.c.bf16 %v5346_v28, %v705_v31 }
 0x10d   :  { %5396 = vmatmul.mubr.msk.f32.vlgmr.msra.gmra.mrb[12].mxu0 %vm1030_vm1, %v5269_v10  ;;  %5845 = vmatprep.subr.msk.bf16.mxu0 %vm6502_vm2, %v5843_v30 }
 0x10e   :  { %5403 = vmatmul.mubr.msk.f32.vlgmr.msra.gmra.mrb[12].mxu1 %vm1030_vm1, %v5280_v13  ;;  %5851 = vmatprep.subr.msk.bf16.mxu1 %vm6502_vm2, %v5849_v32 }
 0x10f   :  { %5848 = vmatpush3.bf16.xpose.msk.msra.mxu0 %vm6502_vm2, %v5843_v30  ;;  %5409 = vmatprep.mubr.msk.f32.mxu0 %vm1030_vm1, %v314_v16 }
 0x110   :  { %5854 = vmatpush3.bf16.xpose.msk.msra.mxu1 %vm6502_vm2, %v5849_v32  ;;  %5416 = vmatprep.mubr.msk.f32.mxu1 %vm1030_vm1, %v389_v18 }
 0x111   :  { %v5357_v33 = vpop.f32.mrb[8].mxu0 }
 0x112   :  { %v796_v34 = vpop.f32.mrb[9].mxu0 }
 0x113   :  { %v5855_v35 = vpack.c.bf16 %v5357_v33, %v796_v34  ;;  %v5368_v36 = vpop.f32.mrb[8].mxu1 }
 0x114   :  { %v871_v37 = vpop.f32.mrb[9].mxu1 }
 0x115   :  { %5856 = vmatprep.subr.bf16.mxu0 %v5855_v35  ;;  %v6526_v38 = vpack.c.bf16 %v5368_v36, %v871_v37 }
 0x116   :  { %5410 = vmatmul.mubr.msk.f32.vlgmr.msra.gmra.mrb[14].mxu0 %vm1030_vm1, %v5291_v15 }
 0x117   :  { %5417 = vmatmul.mubr.msk.f32.vlgmr.msra.gmra.mrb[14].mxu1 %vm1030_vm1, %v5302_v17  ;;  %5858 = vmatpush3.bf16.msra.mxu0 %v5855_v35 }
 0x118   :  { %5860 = vmatprep.subr.bf16.mxu0 %v6526_v38 }
 0x119   :  { %v5379_v39 = vpop.f32.mrb[10].mxu0 }
 0x11a   :  { %v946_v40 = vpop.f32.mrb[11].mxu0 }
 0x11b   :  { %v6531_v41 = vpack.c.bf16 %v5379_v39, %v946_v40  ;;  %v5390_v42 = vpop.f32.mrb[10].mxu1 }
 0x11c   :  { %v1021_v43 = vpop.f32.mrb[11].mxu1 }
 0x11d   :  { %v5867_v44 = vpack.c.bf16 %v5390_v42, %v1021_v43 }
 0x11f   :  { %5868 = vmatprep.subr.bf16.mxu1 %v5867_v44 }
 0x120   :  { %5870 = vmatpush3.bf16.msra.mxu1 %v5867_v44 }
 0x1e0   :  { %v5397_v46 = vpop.f32.mrb[12].mxu0 }
 0x1e1   :  { %v5404_v49 = vpop.f32.mrb[12].mxu1  ;;  %v1109_v50 = vpop.f32.mrb[13].mxu0  ;;  %v1115_v55 = vadd.f32 %v5397_v46, %v6546_v48 }
 0x1e2   :  { %v1110_v52 = vadd.f32 %v1109_v50, %v6536_v45  ;;  %v1196_v53 = vpop.f32.mrb[13].mxu1  ;;  %v1202_v57 = vadd.f32 %v5404_v49, %v6551_v51 }
 0x1e3   :  { %v1197_v54 = vadd.f32 %v1196_v53, %v6541_v47  ;;  %v1383_v61 = vsel %vm1379_vm3, %v1115_v55, -inf }
 0x1e4   :  { %v1380_v56 = vsel %vm1379_vm3, %v1110_v52, -inf  ;;  %v1389_v63 = vsel %vm1379_vm3, %v1202_v57, -inf }
 0x1e5   :  { %v1386_v58 = vsel %vm1379_vm3, %v1197_v54, -inf  ;;  %1381 = vmax.xlane.f32.xlu0 %v1380_v56 }
 0x1e6   :  { %1387 = vmax.xlane.f32.xlu1 %v1386_v58 }
 0x1e9   :  { %v5411_v62 = vpop.f32.mrb[14].mxu0  ;;  %1384 = vmax.xlane.f32.xlu0 %v1383_v61 }
 0x1ea   :  { %v1289_v0 = vadd.f32 %v5411_v62, %v6562_v59  ;;  %v5418_v2 = vpop.f32.mrb[14].mxu1  ;;  %1390 = vmax.xlane.f32.xlu1 %v1389_v63  ;;  %v1283_v4 = vpop.f32.mrb[15].mxu0 }
 0x1eb   :  { %v1370_v5 = vpop.f32.mrb[15].mxu1  ;;  %v1284_v6 = vadd.f32 %v1283_v4, %v6567_v60  ;;  %v1376_v8 = vadd.f32 %v5418_v2, %v6575_v1 }
 0x1ec   :  { %v1395_v7 = vsel %vm1379_vm3, %v1289_v0, -inf  ;;  %v1371_v9 = vadd.f32 %v1370_v5, %v6580_v3 }
 0x1ed   :  { %v1392_v10 = vsel %vm1379_vm3, %v1284_v6, -inf  ;;  %v1401_v12 = vsel %vm1379_vm3, %v1376_v8, -inf }
 0x1ee   :  { %1396 = vmax.xlane.f32.xlu1 %v1395_v7  ;;  %1393 = vmax.xlane.f32.xlu0 %v1392_v10  ;;  %v1398_v13 = vsel %vm1379_vm3, %v1371_v9, -inf }
 0x1f2   :  { %1402 = vmax.xlane.f32.xlu1 %v1401_v12  ;;  %1399 = vmax.xlane.f32.xlu0 %v1398_v13 }
 0x272   :  { %v1382_v14 = vpop.xlane.xlu0 %1381 }
 0x273   :  { %v1388_v15 = vpop.xlane.xlu1 %1387  ;;  %v1404_v16 = vsub.f32 %v1110_v52, %v1382_v14 }
 0x274   :  { %v1406_v17 = vsub.f32 %v1197_v54, %v1388_v15 }
 0x275   :  { %v1412_v18 = vmul.f32 1.442695, %v1404_v16 }
 0x276   :  { %v1416_v19 = vmul.f32 1.442695, %v1406_v17  ;;  %v1385_v20 = vpop.xlane.xlu0 %1384 }
 0x277   :  { %6075 = vpow2.f32 %v1412_v18  ;;  %v1391_v21 = vpop.xlane.xlu1 %1390  ;;  %v1405_v24 = vsub.f32 %v1115_v55, %v1385_v20  ;;  %v1792_v20 = vld [vmem:[%s7072_s5] sm:$0xff] }
 0x278   :  { %v1407_v25 = vsub.f32 %v1202_v57, %v1391_v21  ;;  %6077 = vpow2.f32 %v1416_v19 }
 0x279   :  { %v1414_v26 = vmul.f32 1.442695, %v1405_v24 }
 0x27a   :  { %v1418_v27 = vmul.f32 1.442695, %v1407_v25 }
 0x27b   :  { %6079 = vpow2.f32 %v1414_v26  ;;  %v1397_v28 = vpop.xlane.xlu1 %1396  ;;  %v1394_v29 = vpop.xlane.xlu0 %1393 }
 0x27c   :  { %v1409_v30 = vsub.f32 %v1289_v0, %v1397_v28  ;;  %v1408_v31 = vsub.f32 %v1284_v6, %v1394_v29  ;;  %6081 = vpow2.f32 %v1418_v27  ;;  %v1793_v29 = vld [vmem:[%s7072_s5 + $0x8] sm:$0xff] }
 0x27e   :  { %v1422_v32 = vmul.f32 1.442695, %v1409_v30  ;;  %v1420_v33 = vmul.f32 1.442695, %v1408_v31  ;;  %v1794_v31 = vld [vmem:[%s7072_s5 + $0x10] sm:$0xff] }
 0x27f   :  { %v1403_v34 = vpop.xlane.xlu1 %1402  ;;  %v1400_v35 = vpop.xlane.xlu0 %1399 }
 0x280   :  { %6083 = vpow2.f32 %v1422_v32  ;;  %v1411_v36 = vsub.f32 %v1376_v8, %v1403_v34  ;;  %v1410_v37 = vsub.f32 %v1371_v9, %v1400_v35 }
 0x281   :  { %v6076_v39 = vpop.eup %6075  ;;  %6085 = vpow2.f32 %v1420_v33 }
 0x282   :  { %v1426_v40 = vmul.f32 1.442695, %v1411_v36  ;;  %v1424_v42 = vmul.f32 1.442695, %v1410_v37  ;;  %v1428_v43 = vsel %vm1379_vm3, %v6076_v39, 0.0  ;;  %v6078_v44 = vpop.eup %6077  ;;  %v1795_v36 = vld [vmem:[%s7072_s5 + $0x18] sm:$0xff] }
 0x283   :  { %1429 = vadd.xlane.f32.xlu0 %v1428_v43  ;;  %v1434_v49 = vsel %vm1379_vm3, %v6078_v44, 0.0 }
 0x284   :  { %6087 = vpow2.f32 %v1426_v40  ;;  %v4846_v40 = vld [vmem:[%s7073_s6] ss:$0 sm:$0xff] }
 0x285   :  { %v6080_v46 = vpop.eup %6079  ;;  %6089 = vpow2.f32 %v1424_v42 }
 0x286   :  { %v1431_v50 = vsel %vm1379_vm3, %v6080_v46, 0.0  ;;  %v6082_v52 = vpop.eup %6081 }
 0x287   :  { %1435 = vadd.xlane.f32.xlu0 %v1434_v49  ;;  %1432 = vadd.xlane.f32.xlu1 %v1431_v50  ;;  %v1437_v54 = vsel %vm1379_vm3, %v6082_v52, 0.0 }
 0x28a   :  { %v6084_v53 = vpop.eup %6083 }
 0x28b   :  { %v6086_v55 = vpop.eup %6085  ;;  %1438 = vadd.xlane.f32.xlu1 %v1437_v54  ;;  %v1443_v58 = vsel %vm1379_vm3, %v6084_v53, 0.0 }
 0x28c   :  { %v1440_v56 = vsel %vm1379_vm3, %v6086_v55, 0.0 }
 0x28d   :  { %1441 = vadd.xlane.f32.xlu0 %v1440_v56 }
 0x28e   :  { %v6088_v57 = vpop.eup %6087 }
 0x28f   :  { %v6090_v61 = vpop.eup %6089  ;;  %1444 = vadd.xlane.f32.xlu1 %v1443_v58  ;;  %v1449_v63 = vsel %vm1379_vm3, %v6088_v57, 0.0 }
 0x290   :  { %v1446_v62 = vsel %vm1379_vm3, %v6090_v61, 0.0 }
 0x291   :  { %1447 = vadd.xlane.f32.xlu0 %v1446_v62 }
 0x293   :  { %1450 = vadd.xlane.f32.xlu1 %v1449_v63 }
 0x310   :  { %v1430_v0 = vpop.xlane.xlu0 %1429 }
 0x311   :  { %6091 = vrcp.f32 %v1430_v0 }
 0x314   :  { %v1433_v2 = vpop.xlane.xlu1 %1432  ;;  %v1436_v4 = vpop.xlane.xlu0 %1435 }
 0x315   :  { %6093 = vrcp.f32 %v1433_v2  ;;  %v2183_v2 = vld [vmem:[%s7078_s11 + $0x8] sm:$0xff] }
 0x316   :  { %6095 = vrcp.f32 %v1436_v4 }
 0x318   :  { %v1439_v5 = vpop.xlane.xlu1 %1438 }
 0x319   :  { %6097 = vrcp.f32 %v1439_v5  ;;  %v2184_v5 = vld [vmem:[%s7078_s11 + $0x10] sm:$0xff] }
 0x31a   :  { %v1442_v6 = vpop.xlane.xlu0 %1441 }
 0x31b   :  { %v6092_v7 = vpop.eup %6091  ;;  %6099 = vrcp.f32 %v1442_v6  ;;  %v2185_v6 = vld [vmem:[%s7078_s11 + $0x18] sm:$0xff] }
 0x31c   :  { %v1445_v8 = vpop.xlane.xlu1 %1444  ;;  %v1453_v9 = vmul.f32 %v6092_v7, %v6076_v39  ;;  %v5875_v7 = vpack.c.bf16 %v2185_v6, %v2184_v5 }
 0x31d   :  { %6101 = vrcp.f32 %v1445_v8  ;;  %v2276_v8 = vld [vmem:[%s7080_s13] sm:$0xff] }
 0x31e   :  { %v1448_v10 = vpop.xlane.xlu0 %1447  ;;  %5423 = vmatprep.mubr.msk.f32.mxu0 %vm1379_vm3, %v1453_v9  ;;  %v2277_v9 = vld [vmem:[%s7080_s13 + $0x8] sm:$0xff] }
 0x31f   :  { %v6094_v12 = vpop.eup %6093  ;;  %6103 = vrcp.f32 %v1448_v10  ;;  %v5879_v10 = vpack.c.bf16 %v2277_v9, %v2276_v8  ;;  %v4858_v8 = vld [vmem:[%s7069_s2 + $0x88] sm:$0xff]  ;;  %v4865_v9 = vld [vmem:[%s7069_s2 + $0xc0] sm:$0xff] }
 0x320   :  { %v6096_v13 = vpop.eup %6095  ;;  %v1455_v14 = vmul.f32 %v6094_v12, %v6080_v46  ;;  %v1451_v15 = vpop.xlane.xlu1 %1450 }
 0x321   :  { %6105 = vrcp.f32 %v1451_v15  ;;  %v1457_v16 = vmul.f32 %v6096_v13, %v6078_v44 }
 0x322   :  { %5424 = vmatmul.mubr.msk.f32.vlgmr.msra.gmra.mrb[16].mxu0 %vm1379_vm3, %v1455_v14 }
 0x323   :  { %v6098_v17 = vpop.eup %6097  ;;  %5862 = vmatpush3.bf16.msra.mxu0 %v6526_v38  ;;  %5430 = vmatprep.mubr.msk.f32.mxu0 %vm1379_vm3, %v1457_v16 }
 0x324   :  { %v1459_v18 = vmul.f32 %v6098_v17, %v6082_v52  ;;  %5864 = vmatprep.subr.bf16.mxu0 %v6531_v41 }
 0x325   :  { %v6100_v19 = vpop.eup %6099 }
 0x326   :  { %5431 = vmatmul.mubr.msk.f32.vlgmr.msra.gmra.mrb[18].mxu0 %vm1379_vm3, %v1459_v18  ;;  %v1461_v21 = vmul.f32 %v6100_v19, %v6086_v55  ;;  %v4847_v19 = vld [vmem:[%s7074_s7] ss:$0 sm:$0xff] }
 0x327   :  { %v6102_v24 = vpop.eup %6101  ;;  %5866 = vmatpush3.bf16.msra.mxu0 %v6531_v41 }
 0x328   :  { %v1463_v25 = vmul.f32 %v6102_v24, %v6084_v53  ;;  %5437 = vmatprep.mubr.msk.f32.mxu0 %vm1379_vm3, %v1461_v21  ;;  %5447 = vmatprep.subr.mxu0 %v1792_v20 }
 0x329   :  { %v6104_v38 = vpop.eup %6103 }
 0x32a   :  { %5438 = vmatmul.mubr.msk.f32.vlgmr.msra.gmra.mrb[20].mxu0 %vm1379_vm3, %v1463_v25  ;;  %v1465_v26 = vmul.f32 %v6104_v38, %v6090_v61  ;;  %v4848_v25 = vld [vmem:[%s7075_s8] ss:$0 sm:$0xff] }
 0x32b   :  { %v6106_v27 = vpop.eup %6105  ;;  %5448 = vmatpush3.msra.mxu0 %v1792_v20 }
 0x32c   :  { %v1467_v28 = vmul.f32 %v6106_v27, %v6088_v57  ;;  %5444 = vmatprep.mubr.msk.f32.mxu1 %vm1379_vm3, %v1465_v26  ;;  %5452 = vmatprep.subr.mxu0 %v1793_v29  ;;  %v2278_v27 = vld [vmem:[%s7080_s13 + $0x10] sm:$0xff] }
 0x32e   :  { %5445 = vmatmul.mubr.msk.f32.vlgmr.msra.gmra.mrb[16].mxu1 %vm1379_vm3, %v1467_v28  ;;  %v2279_v28 = vld [vmem:[%s7080_s13 + $0x18] sm:$0xff] }
 0x3f5   :  { %v5425_v41 = vpop.f32.mrb[16].mxu0 }
 0x3f6   :  { %v1540_v30 = vpop.f32.mrb[17].mxu0 }
 0x3f7   :  { %5449 = vmatprep.mubr.msk.f32.mxu0 %vm1030_vm1, %v1540_v30  ;;  %v5883_v30 = vpack.c.bf16 %v2279_v28, %v2278_v27 }
 0x3f8   :  { %5450 = vmatmul.mubr.msk.f32.vlgmr.msra.gmra.mrb[22].mxu0 %vm1030_vm1, %v5425_v41 }
 0x3f9   :  { %5453 = vmatpush3.msra.mxu0 %v1793_v29  ;;  %v5432_v32 = vpop.f32.mrb[18].mxu0 }
 0x3fa   :  { %v1621_v33 = vpop.f32.mrb[19].mxu0  ;;  %5457 = vmatprep.subr.mxu0 %v1794_v31 }
 0x3fb   :  { %5454 = vmatprep.mubr.msk.f32.mxu0 %vm1030_vm1, %v1621_v33 }
 0x3fd   :  { %v5439_v34 = vpop.f32.mrb[20].mxu0 }
 0x3fe   :  { %v1702_v35 = vpop.f32.mrb[21].mxu0 }
 0x400   :  { %5455 = vmatmul.mubr.msk.f32.vlgmr.msra.gmra.mrb[22].mxu0 %vm1030_vm1, %v5432_v32  ;;  %v2281_v32 = vld [vmem:[%s7080_s13 + $0x28] sm:$0xff] }
 0x401   :  { %5458 = vmatpush3.msra.mxu0 %v1794_v31  ;;  %v5446_v37 = vpop.f32.mrb[16].mxu1  ;;  %5459 = vmatprep.mubr.msk.f32.mxu0 %vm1030_vm1, %v1702_v35  ;;  %v2280_v31 = vld [vmem:[%s7080_s13 + $0x20] sm:$0xff]  ;;  %v2283_v35 = vld [vmem:[%s7080_s13 + $0x38] sm:$0xff] }
 0x402   :  { %v1783_v39 = vpop.f32.mrb[17].mxu1  ;;  %5462 = vmatprep.subr.mxu0 %v1795_v36  ;;  %v5887_v33 = vpack.c.bf16 %v2281_v32, %v2280_v31 }
 0x408   :  { %5460 = vmatmul.mubr.msk.f32.vlgmr.msra.gmra.mrb[22].mxu0 %vm1030_vm1, %v5439_v34  ;;  %v2282_v34 = vld [vmem:[%s7080_s13 + $0x30] sm:$0xff] }
 0x409   :  { %5463 = vmatpush3.msra.mxu0 %v1795_v36  ;;  %5464 = vmatprep.mubr.msk.f32.mxu0 %vm1030_vm1, %v1783_v39  ;;  %v5891_v36 = vpack.c.bf16 %v2283_v35, %v2282_v34 }
 0x410   :  { %5465 = vmatmul.mubr.msk.f32.vlgmr.msra.gmra.mrb[22].mxu0 %vm1030_vm1, %v5446_v37  ;;  %v4849_v37 = vld [vmem:[%s7079_s12] ss:$0 sm:$0xff] }
 0x4e3   :  { %v5466_v42 = vpop.f32.mrb[22].mxu0 }
 0x4e4   :  { %v6055_v43 = vadd.f32 %v5466_v42, %v4846_v40  ;;  %v2111_v44 = vpop.f32.mrb[23].mxu0 }
 0x4e5   :  { %v6056_v46 = vadd.f32 %v4846_v40, %v2111_v44 }
 0x4e6   :  { %v2136_v49 = vadd.f32 %v6055_v43, %v6356_v23 }
 0x4e7   :  { %v2135_v50 = vadd.f32 %v6056_v46, %v6326_v11  ;;  %v2182_v11 = vld [vmem:[%s7078_s11] sm:$0xff] }
 0x4e8   :  { %v2142_v52 = vsel %vm91_vm0, %v2136_v49, 0.0  ;;  %v5871_v4 = vpack.c.bf16 %v2183_v2, %v2182_v11 }
 0x4e9   :  { %2143 = vadd.xlane.f32.xlu1 %v2142_v52  ;;  %v2139_v53 = vsel %vm91_vm0, %v2135_v50, 0.0 }
 0x4ea   :  { %2140 = vadd.xlane.f32.xlu0 %v2139_v53  ;;  %5872 = vmatprep.subr.bf16.mxu1 %v5871_v4 }
 0x4eb   :  { %5874 = vmatpush3.bf16.msra.mxu1 %v5871_v4 }
 0x4ec   :  { %5876 = vmatprep.subr.bf16.mxu1 %v5875_v7 }
 0x4ef   :  { %5878 = vmatpush3.bf16.msra.mxu1 %v5875_v7  ;;  %v4857_v7 = vld [vmem:[%s7069_s2 + $0x80] sm:$0xff] }
 0x4f0   :  { %5880 = vmatprep.subr.bf16.mxu1 %v5879_v10 }
 0x576   :  { %v2144_v54 = vpop.xlane.xlu1 %2143 }
 0x577   :  { %v2147_v55 = vmul.f32 0.03125, %v2144_v54  ;;  %v2141_v56 = vpop.xlane.xlu0 %2140 }
 0x578   :  { %v2146_v57 = vmul.f32 0.03125, %v2141_v56 }
 0x579   :  { %v2149_v58 = vsub.f32 %v2136_v49, %v2147_v55  ;;  %v4852_v49 = vld [vmem:[%s7081_s14] ss:$0 sm:$0xff] }
 0x57a   :  { %v2148_v61 = vsub.f32 %v2135_v50, %v2146_v57 }
 0x57b   :  { %v2151_v62 = vmul.f32 %v2149_v58, %v2149_v58 }
 0x57c   :  { %v2150_v63 = vmul.f32 %v2148_v61, %v2148_v61 }
 0x57d   :  { %v2155_v0 = vsel %vm91_vm0, %v2151_v62, 0.0 }
 0x57e   :  { %2156 = vadd.xlane.f32.xlu1 %v2155_v0  ;;  %v2152_v23 = vsel %vm91_vm0, %v2150_v63, 0.0 }
 0x57f   :  { %2153 = vadd.xlane.f32.xlu0 %v2152_v23 }
 0x60b   :  { %v2157_v12 = vpop.xlane.xlu1 %2156 }
 0x60c   :  { %v2159_v13 = vmul.f32 0.03125, %v2157_v12  ;;  %v2154_v14 = vpop.xlane.xlu0 %2153  ;;  %v4866_v12 = vld [vmem:[%s7069_s2 + $0xc8] sm:$0xff] }
 0x60d   :  { %v2158_v15 = vmul.f32 0.03125, %v2154_v14  ;;  %v4859_v14 = vld [vmem:[%s7069_s2 + $0x90] sm:$0xff] }
 0x60e   :  { %v2161_v16 = vadd.f32 1e-05, %v2159_v13  ;;  %v5911_v13 = vpack.c.bf16 %v4866_v12, %v4865_v9  ;;  %v4888_v12 = vld [vmem:[%s7070_s3 + $0xb8] sm:$0xff] }
 0x60f   :  { %v2160_v17 = vadd.f32 1e-05, %v2158_v15  ;;  %v4860_v15 = vld [vmem:[%s7069_s2 + $0x98] sm:$0xff] }
 0x610   :  { %6107 = vrsqrt.f32 %v2161_v16  ;;  %v4867_v16 = vld [vmem:[%s7069_s2 + $0xd0] sm:$0xff] }
 0x611   :  { %6109 = vrsqrt.f32 %v2160_v17  ;;  %v5899_v17 = vpack.c.bf16 %v4860_v15, %v4859_v14  ;;  %v4908_v14 = vld [vmem:[%s7071_s4 + $0x98] sm:$0xff] }
 0x61a   :  { %v6108_v18 = vpop.eup %6107 }
 0x61b   :  { %v6110_v20 = vpop.eup %6109  ;;  %v2165_v21 = vmul.f32 %v6108_v18, %v2149_v58  ;;  %v4868_v18 = vld [vmem:[%s7069_s2 + $0xd8] sm:$0xff] }
 0x61c   :  { %v2164_v24 = vmul.f32 %v6110_v20, %v2148_v61  ;;  %v4861_v20 = vld [vmem:[%s7069_s2 + $0xa0] sm:$0xff] }
 0x61d   :  { %v2173_v38 = vmul.f32 %v4847_v19, %v2165_v21  ;;  %v4862_v21 = vld [vmem:[%s7069_s2 + $0xa8] sm:$0xff] }
 0x61e   :  { %v2172_v26 = vmul.f32 %v4847_v19, %v2164_v24  ;;  %v5915_v19 = vpack.c.bf16 %v4868_v18, %v4867_v16  ;;  %v4881_v24 = vld [vmem:[%s7070_s3 + $0x80] sm:$0xff] }
 0x61f   :  { %v2181_v41 = vadd.f32 %v4848_v25, %v2173_v38  ;;  %v4882_v38 = vld [vmem:[%s7070_s3 + $0x88] sm:$0xff]  ;;  %v4893_v16 = vld [vmem:[%s7070_s3 + $0xe0] sm:$0xff] }
 0x620   :  { %v2180_v29 = vadd.f32 %v4848_v25, %v2172_v26  ;;  %v5903_v25 = vpack.c.bf16 %v4862_v21, %v4861_v20  ;;  %v5927_v26 = vpack.c.bf16 %v4882_v38, %v4881_v24  ;;  %v4914_v20 = vld [vmem:[%s7071_s4 + $0xc8] sm:$0xff]  ;;  %v4896_v38 = vld [vmem:[%s7070_s3 + $0xf8] sm:$0xff] }
 0x622   :  { %5475 = vmatprep.mubr.msk.f32.mxu1 %vm91_vm0, %v2180_v29 }
 0x623   :  { %5476 = vmatmul.mubr.msk.f32.vlgmr.msra.gmra.mrb[18].mxu1 %vm91_vm0, %v2181_v41 }
 0x624   :  { %5882 = vmatpush3.bf16.msra.mxu1 %v5879_v10  ;;  %v5895_v10 = vpack.c.bf16 %v4858_v8, %v4857_v7  ;;  %v4906_v7 = vld [vmem:[%s7071_s4 + $0x88] sm:$0xff] }
 0x625   :  { %5884 = vmatprep.subr.bf16.mxu1 %v5883_v30 }
 0x626   :  { %5896 = vmatprep.subr.bf16.mxu0 %v5895_v10 }
 0x627   :  { %5898 = vmatpush3.bf16.msra.mxu0 %v5895_v10  ;;  %v4887_v10 = vld [vmem:[%s7070_s3 + $0xb0] sm:$0xff] }
 0x628   :  { %5886 = vmatpush3.bf16.msra.mxu1 %v5883_v30  ;;  %5900 = vmatprep.subr.bf16.mxu0 %v5899_v17  ;;  %v5939_v15 = vpack.c.bf16 %v4888_v12, %v4887_v10 }
 0x629   :  { %5888 = vmatprep.subr.bf16.mxu1 %v5887_v33 }
 0x62b   :  { %5902 = vmatpush3.bf16.msra.mxu0 %v5899_v17  ;;  %v4894_v17 = vld [vmem:[%s7070_s3 + $0xe8] sm:$0xff] }
 0x62c   :  { %5890 = vmatpush3.bf16.msra.mxu1 %v5887_v33  ;;  %5904 = vmatprep.subr.bf16.mxu0 %v5903_v25  ;;  %v4855_v33 = vld [vmem:[%s7076_s9] ss:$0 sm:$0xff]  ;;  %v5951_v21 = vpack.c.bf16 %v4894_v17, %v4893_v16 }
 0x62d   :  { %5892 = vmatprep.subr.bf16.mxu1 %v5891_v36 }
 0x630   :  { %5894 = vmatpush3.bf16.msra.mxu1 %v5891_v36 }
 0x631   :  { %5912 = vmatprep.subr.bf16.mxu1 %v5911_v13 }
 0x6f6   :  { %v5477_v39 = vpop.f32.mrb[18].mxu1 }
 0x6f7   :  { %v2271_v40 = vadd.f32 %v5477_v39, %v4849_v37  ;;  %v2265_v42 = vpop.f32.mrb[19].mxu1 }
 0x6f8   :  { %v2266_v43 = vadd.f32 %v4849_v37, %v2265_v42  ;;  %v4856_v37 = vld [vmem:[%s7077_s10] ss:$0 sm:$0xff]  ;;  %v4863_v42 = vld [vmem:[%s7069_s2 + $0xb0] sm:$0xff] }
 0x6f9   :  { %v2275_v46 = vmax.f32 %v2271_v40, 0.0 }
 0x6fa   :  { %v2274_v44 = vmax.f32 %v2266_v43, 0.0  ;;  %v4864_v43 = vld [vmem:[%s7069_s2 + $0xb8] sm:$0xff] }
 0x6fc   :  { %5494 = vmatprep.mubr.msk.f32.mxu1 %vm2291_vm4, %v2274_v44  ;;  %v4883_v44 = vld [vmem:[%s7070_s3 + $0x90] sm:$0xff] }
 0x6fd   :  { %5495 = vmatmul.mubr.msk.f32.vlgmr.msra.gmra.mrb[20].mxu1 %vm2291_vm4, %v2275_v46  ;;  %v4884_v46 = vld [vmem:[%s7070_s3 + $0x98] sm:$0xff] }
 0x6fe   :  { %5914 = vmatpush3.bf16.msra.mxu1 %v5911_v13  ;;  %v4907_v13 = vld [vmem:[%s7071_s4 + $0x90] sm:$0xff] }
 0x6ff   :  { %5916 = vmatprep.subr.bf16.mxu1 %v5915_v19  ;;  %v5963_v18 = vpack.c.bf16 %v4908_v14, %v4907_v13 }
 0x702   :  { %5918 = vmatpush3.bf16.msra.mxu1 %v5915_v19  ;;  %v4913_v19 = vld [vmem:[%s7071_s4 + $0xc0] sm:$0xff] }
 0x703   :  { %5928 = vmatprep.subr.bf16.mxu1 %v5927_v26  ;;  %v5975_v24 = vpack.c.bf16 %v4914_v20, %v4913_v19 }
 0x7d0   :  { %v5496_v50 = vpop.f32.mrb[20].mxu1 }
 0x7d1   :  { %v2370_v52 = vadd.f32 %v5496_v50, %v4852_v49  ;;  %v2364_v53 = vpop.f32.mrb[21].mxu1 }
 0x7d2   :  { %v2365_v54 = vadd.f32 %v4852_v49, %v2364_v53  ;;  %v5907_v53 = vpack.c.bf16 %v4864_v43, %v4863_v42 }
 0x7d3   :  { %v2374_v55 = vadd.f32 %v2370_v52, %v2181_v41  ;;  %v4869_v52 = vld [vmem:[%s7069_s2 + $0xe0] sm:$0xff] }
 0x7d4   :  { %v2373_v56 = vadd.f32 %v2365_v54, %v2180_v29  ;;  %v5931_v54 = vpack.c.bf16 %v4884_v46, %v4883_v44 }
 0x7d5   :  { %v2380_v57 = vsel %vm91_vm0, %v2374_v55, 0.0 }
 0x7d6   :  { %2381 = vadd.xlane.f32.xlu1 %v2380_v57  ;;  %v2377_v58 = vsel %vm91_vm0, %v2373_v56, 0.0  ;;  %v4890_v57 = vld [vmem:[%s7070_s3 + $0xc8] sm:$0xff] }
 0x7d7   :  { %2378 = vadd.xlane.f32.xlu0 %v2377_v58 }
 0x863   :  { %v2382_v61 = vpop.xlane.xlu1 %2381 }
 0x864   :  { %v2384_v62 = vmul.f32 0.03125, %v2382_v61  ;;  %v2379_v63 = vpop.xlane.xlu0 %2378 }
 0x865   :  { %v2383_v0 = vmul.f32 0.03125, %v2379_v63  ;;  %v4872_v63 = vld [vmem:[%s7069_s2 + $0xf8] sm:$0xff] }
 0x866   :  { %v2386_v23 = vsub.f32 %v2374_v55, %v2384_v62  ;;  %v4870_v55 = vld [vmem:[%s7069_s2 + $0xe8] sm:$0xff]  ;;  %v4871_v62 = vld [vmem:[%s7069_s2 + $0xf0] sm:$0xff] }
 0x867   :  { %v2385_v11 = vsub.f32 %v2373_v56, %v2383_v0  ;;  %v4889_v56 = vld [vmem:[%s7070_s3 + $0xc0] sm:$0xff]  ;;  %v5919_v58 = vpack.c.bf16 %v4870_v55, %v4869_v52  ;;  %v4891_v0 = vld [vmem:[%s7070_s3 + $0xd0] sm:$0xff] }
 0x868   :  { %v2388_v2 = vmul.f32 %v2386_v23, %v2386_v23  ;;  %v5943_v61 = vpack.c.bf16 %v4890_v57, %v4889_v56 }
 0x869   :  { %v2387_v4 = vmul.f32 %v2385_v11, %v2385_v11 }
 0x86a   :  { %v2392_v5 = vsel %vm91_vm0, %v2388_v2, 0.0 }
 0x86b   :  { %2393 = vadd.xlane.f32.xlu1 %v2392_v5  ;;  %v2389_v6 = vsel %vm91_vm0, %v2387_v4, 0.0  ;;  %v4885_v4 = vld [vmem:[%s7070_s3 + $0xa0] sm:$0xff]  ;;  %v4886_v5 = vld [vmem:[%s7070_s3 + $0xa8] sm:$0xff] }
 0x86c   :  { %2390 = vadd.xlane.f32.xlu0 %v2389_v6  ;;  %v4905_v6 = vld [vmem:[%s7071_s4 + $0x80] sm:$0xff]  ;;  %v5935_v8 = vpack.c.bf16 %v4886_v5, %v4885_v4 }
 0x86d   :  { %v5959_v9 = vpack.c.bf16 %v4906_v7, %v4905_v6 }
 0x8f8   :  { %v2394_v27 = vpop.xlane.xlu1 %2393 }
 0x8f9   :  { %v2396_v28 = vmul.f32 0.03125, %v2394_v27  ;;  %v2391_v29 = vpop.xlane.xlu0 %2390  ;;  %v4916_v27 = vld [vmem:[%s7071_s4 + $0xd8] sm:$0xff] }
 0x8fa   :  { %v2395_v41 = vmul.f32 0.03125, %v2391_v29  ;;  %v4909_v29 = vld [vmem:[%s7071_s4 + $0xa0] sm:$0xff] }
 0x8fb   :  { %v2398_v30 = vadd.f32 1e-05, %v2396_v28 }
 0x8fc   :  { %v2397_v31 = vadd.f32 1e-05, %v2395_v41  ;;  %v4910_v41 = vld [vmem:[%s7071_s4 + $0xa8] sm:$0xff] }
 0x8fd   :  { %6111 = vrsqrt.f32 %v2398_v30 }
 0x8fe   :  { %6113 = vrsqrt.f32 %v2397_v31  ;;  %v5967_v31 = vpack.c.bf16 %v4910_v41, %v4909_v29 }
 0x907   :  { %v6112_v32 = vpop.eup %6111 }
 0x908   :  { %v6114_v34 = vpop.eup %6113  ;;  %v2402_v35 = vmul.f32 %v6112_v32, %v2386_v23  ;;  %v4892_v23 = vld [vmem:[%s7070_s3 + $0xd8] sm:$0xff]  ;;  %v4911_v32 = vld [vmem:[%s7071_s4 + $0xb0] sm:$0xff] }
 0x909   :  { %v2401_v36 = vmul.f32 %v6114_v34, %v2385_v11  ;;  %v5923_v11 = vpack.c.bf16 %v4872_v63, %v4871_v62  ;;  %v5947_v2 = vpack.c.bf16 %v4892_v23, %v4891_v0 }
 0x90a   :  { %v2410_v39 = vmul.f32 %v4855_v33, %v2402_v35  ;;  %v4917_v35 = vld [vmem:[%s7071_s4 + $0xe0] sm:$0xff] }
 0x90b   :  { %v2409_v40 = vmul.f32 %v4855_v33, %v2401_v36  ;;  %v4912_v33 = vld [vmem:[%s7071_s4 + $0xb8] sm:$0xff]  ;;  %v4918_v36 = vld [vmem:[%s7071_s4 + $0xe8] sm:$0xff] }
 0x90c   :  { %v6749_v50 = vadd.f32 %v4856_v37, %v2410_v39  ;;  %v5971_v34 = vpack.c.bf16 %v4912_v33, %v4911_v32  ;;  %v4919_v39 = vld [vmem:[%s7071_s4 + $0xf0] sm:$0xff] }
 0x90d   :  { %v6747_v49 = vadd.f32 %v4856_v37, %v2409_v40  ;;  %v5983_v37 = vpack.c.bf16 %v4918_v36, %v4917_v35  ;;  %v4920_v40 = vld [vmem:[%s7071_s4 + $0xf8] sm:$0xff] }
 0x90e   :  { %v5987_v42 = vpack.c.bf16 %v4920_v40, %v4919_v39 }
 0x90f   :  { %5505 = vmatprep.mubr.msk.f32.mxu0 %vm91_vm0, %v6747_v49  ;;  %5527 = vmatprep.mubr.msk.f32.mxu1 %vm91_vm0, %v6747_v49 }
 0x910   :  { %5506 = vmatmul.mubr.msk.f32.vlgmr.msra.gmra.mrb[24].mxu0 %vm91_vm0, %v6749_v50  ;;  %5528 = vmatmul.mubr.msk.f32.vlgmr.msra.gmra.mrb[22].mxu1 %vm91_vm0, %v6749_v50 }
 0x911   :  { %5906 = vmatpush3.bf16.msra.mxu0 %v5903_v25  ;;  %5930 = vmatpush3.bf16.msra.mxu1 %v5927_v26  ;;  %v4895_v25 = vld [vmem:[%s7070_s3 + $0xf0] sm:$0xff] }
 0x912   :  { %5516 = vmatprep.mubr.msk.f32.mxu0 %vm91_vm0, %v6747_v49  ;;  %5549 = vmatprep.mubr.msk.f32.mxu1 %vm91_vm0, %v6747_v49  ;;  %v4915_v26 = vld [vmem:[%s7071_s4 + $0xd0] sm:$0xff]  ;;  %v5955_v28 = vpack.c.bf16 %v4896_v38, %v4895_v25  ;;  %s6206_s4 = smov [#allocation5]  }
 0x913   :  { %5908 = vmatprep.subr.bf16.mxu0 %v5907_v53  ;;  %5932 = vmatprep.subr.bf16.mxu1 %v5931_v54  ;;  %v5979_v30 = vpack.c.bf16 %v4916_v27, %v4915_v26  ;;  %s4778_s20 = sshll.u32 %s6206_s4, 4  ;;  %s4779_s20 = int_to_ptr.vmem [resolvable:$true] %s4778_s20 }
 0x914   :  { %p6182_p9 = scmp.lt.s32.totalorder %s4779_s20, %s4779_s20 }
 0x915   :  { %5910 = vmatpush3.bf16.msra.mxu0 %v5907_v53  ;;  %5934 = vmatpush3.bf16.msra.mxu1 %v5931_v54 }
 0x916   :  { %5920 = vmatprep.subr.bf16.mxu0 %v5919_v58  ;;  %5944 = vmatprep.subr.bf16.mxu1 %v5943_v61 }
 0x918   :  { %5517 = vmatmul.mubr.msk.f32.vlgmr.msra.gmra.mrb[26].mxu0 %vm91_vm0, %v6749_v50  ;;  %5550 = vmatmul.mubr.msk.f32.vlgmr.msra.gmra.mrb[24].mxu1 %vm91_vm0, %v6749_v50 }
 0x919   :  { %5922 = vmatpush3.bf16.msra.mxu0 %v5919_v58  ;;  %5538 = vmatprep.mubr.msk.f32.mxu0 %vm91_vm0, %v6747_v49 }
 0x91a   :  { %5946 = vmatpush3.bf16.msra.mxu1 %v5943_v61  ;;  %5571 = vmatprep.mubr.msk.f32.mxu1 %vm91_vm0, %v6747_v49 }
 0x91b   :  { %5924 = vmatprep.subr.bf16.mxu0 %v5923_v11  ;;  %5948 = vmatprep.subr.bf16.mxu1 %v5947_v2 }
 0x91d   :  { %5926 = vmatpush3.bf16.msra.mxu0 %v5923_v11 }
 0x91e   :  { %5950 = vmatpush3.bf16.msra.mxu1 %v5947_v2  ;;  %5936 = vmatprep.subr.bf16.mxu0 %v5935_v8 }
 0x91f   :  { %5960 = vmatprep.subr.bf16.mxu1 %v5959_v9 }
 0x920   :  { %5539 = vmatmul.mubr.msk.f32.vlgmr.msra.gmra.mrb[28].mxu0 %vm91_vm0, %v6749_v50 }
 0x921   :  { %5572 = vmatmul.mubr.msk.f32.vlgmr.msra.gmra.mrb[26].mxu1 %vm91_vm0, %v6749_v50  ;;  %5938 = vmatpush3.bf16.msra.mxu0 %v5935_v8 }
 0x922   :  { %5560 = vmatprep.mubr.msk.f32.mxu0 %vm91_vm0, %v6747_v49  ;;  %5962 = vmatpush3.bf16.msra.mxu1 %v5959_v9 }
 0x923   :  { %5593 = vmatprep.mubr.msk.f32.mxu1 %vm91_vm0, %v6747_v49  ;;  %5940 = vmatprep.subr.bf16.mxu0 %v5939_v15 }
 0x924   :  { %5964 = vmatprep.subr.bf16.mxu1 %v5963_v18 }
 0x925   :  { %5942 = vmatpush3.bf16.msra.mxu0 %v5939_v15 }
 0x926   :  { %5966 = vmatpush3.bf16.msra.mxu1 %v5963_v18  ;;  %5952 = vmatprep.subr.bf16.mxu0 %v5951_v21 }
 0x927   :  { %5976 = vmatprep.subr.bf16.mxu1 %v5975_v24 }
 0x928   :  { %5561 = vmatmul.mubr.msk.f32.vlgmr.msra.gmra.mrb[30].mxu0 %vm91_vm0, %v6749_v50 }
 0x929   :  { %5594 = vmatmul.mubr.msk.f32.vlgmr.msra.gmra.mrb[28].mxu1 %vm91_vm0, %v6749_v50  ;;  %5954 = vmatpush3.bf16.msra.mxu0 %v5951_v21 }
 0x92a   :  { %5582 = vmatprep.mubr.msk.f32.mxu0 %vm91_vm0, %v6747_v49  ;;  %5978 = vmatpush3.bf16.msra.mxu1 %v5975_v24 }
 0x92b   :  { %5615 = vmatprep.mubr.msk.f32.mxu1 %vm91_vm0, %v6747_v49  ;;  %5956 = vmatprep.subr.bf16.mxu0 %v5955_v28 }
 0x92c   :  { %5980 = vmatprep.subr.bf16.mxu1 %v5979_v30 }
 0x92d   :  { %5958 = vmatpush3.bf16.msra.mxu0 %v5955_v28 }
 0x92e   :  { %5982 = vmatpush3.bf16.msra.mxu1 %v5979_v30  ;;  %5968 = vmatprep.subr.bf16.mxu0 %v5967_v31 }
 0x930   :  { %5583 = vmatmul.mubr.msk.f32.vlgmr.msra.gmra.mrb[32].mxu0 %vm91_vm0, %v6749_v50 }
 0x931   :  { %5616 = vmatmul.mubr.msk.f32.vlgmr.msra.gmra.mrb[30].mxu1 %vm91_vm0, %v6749_v50  ;;  %5970 = vmatpush3.bf16.msra.mxu0 %v5967_v31 }
 0x932   :  { %5604 = vmatprep.mubr.msk.f32.mxu0 %vm91_vm0, %v6747_v49  ;;  %5972 = vmatprep.subr.bf16.mxu0 %v5971_v34 }
 0x935   :  { %5974 = vmatpush3.bf16.msra.mxu0 %v5971_v34 }
 0x936   :  { %5984 = vmatprep.subr.bf16.mxu0 %v5983_v37 }
 0x938   :  { %5605 = vmatmul.mubr.msk.f32.vlgmr.msra.gmra.mrb[34].mxu0 %vm91_vm0, %v6749_v50 }
 0x939   :  { %5986 = vmatpush3.bf16.msra.mxu0 %v5983_v37  ;;  %5626 = vmatprep.mubr.msk.f32.mxu0 %vm91_vm0, %v6747_v49 }
 0x93a   :  { %5988 = vmatprep.subr.bf16.mxu0 %v5987_v42 }
 0x93d   :  { %5990 = vmatpush3.bf16.msra.mxu0 %v5987_v42 }
 0x940   :  { %5627 = vmatmul.mubr.msk.f32.vlgmr.msra.gmra.mrb[36].mxu0 %vm91_vm0, %v6749_v50 }
 0x9e3   :  { %v5507_v43 = vpop.f32.mrb[24].mxu0  ;;  %v5529_v44 = vpop.f32.mrb[22].mxu1 }
 0x9e4   :  { %v2508_v46 = vpop.f32.mrb[25].mxu0  ;;  %v2658_v52 = vpop.f32.mrb[23].mxu1 }
 0x9e5   :  { %5633 = vmatprep.mubr.msk.f32.mxu1 %vm1030_vm1, %v2508_v46 }
 0x9eb   :  { %v5518_v53 = vpop.f32.mrb[26].mxu0  ;;  %v5551_v54 = vpop.f32.mrb[24].mxu1 }
 0x9ec   :  { %v2583_v55 = vpop.f32.mrb[27].mxu0  ;;  %v2825_v56 = vpop.f32.mrb[25].mxu1 }
 0x9ed   :  { %v5991_v57 = vpack.c.bf16 %v5551_v54, %v2825_v56  ;;  %5640 = vmatprep.mubr.msk.f32.mxu0 %vm1030_vm1, %v2583_v55 }
 0x9ef   :  { %5993 = vmatprep.subr.msk.bf16.mxu1 %vm6502_vm2, %v5991_v57 }
 0x9f0   :  { %5996 = vmatpush3.bf16.xpose.msk.msra.mxu1 %vm6502_vm2, %v5991_v57 }
 0x9f3   :  { %v5540_v58 = vpop.f32.mrb[28].mxu0 }
 0x9f4   :  { %v5573_v61 = vpop.f32.mrb[26].mxu1  ;;  %v2733_v62 = vpop.f32.mrb[29].mxu0 }
 0x9f5   :  { %v2975_v63 = vpop.f32.mrb[27].mxu1 }
 0x9f6   :  { %v6003_v0 = vpack.c.bf16 %v5573_v61, %v2975_v63 }
 0x9f7   :  { %5634 = vmatmul.mubr.msk.f32.vlgmr.msra.gmra.mrb[32].mxu1 %vm1030_vm1, %v5507_v43 }
 0x9f8   :  { %6005 = vmatprep.subr.msk.bf16.mxu1 %vm6502_vm2, %v6003_v0  ;;  %5647 = vmatprep.mubr.msk.f32.mxu1 %vm1030_vm1, %v2658_v52 }
 0x9f9   :  { %6008 = vmatpush3.bf16.xpose.msk.msra.mxu1 %vm6502_vm2, %v6003_v0 }
 0x9fb   :  { %v5562_v23 = vpop.f32.mrb[30].mxu0 }
 0x9fc   :  { %v5595_v11 = vpop.f32.mrb[28].mxu1  ;;  %v2900_v2 = vpop.f32.mrb[31].mxu0 }
 0x9fd   :  { %v5997_v4 = vpack.c.bf16 %v5562_v23, %v2900_v2  ;;  %v3142_v5 = vpop.f32.mrb[29].mxu1 }
 0x9fe   :  { %v6015_v6 = vpack.c.bf16 %v5595_v11, %v3142_v5 }
 0x9ff   :  { %5999 = vmatprep.subr.msk.bf16.mxu0 %vm6502_vm2, %v5997_v4 }
 0xa00   :  { %5648 = vmatmul.mubr.msk.f32.vlgmr.msra.gmra.mrb[34].mxu1 %vm1030_vm1, %v5529_v44  ;;  %6016 = vmatprep.subr.bf16.mxu1 %v6015_v6 }
 0xa01   :  { %6002 = vmatpush3.bf16.xpose.msk.msra.mxu0 %vm6502_vm2, %v5997_v4  ;;  %6018 = vmatpush3.bf16.msra.mxu1 %v6015_v6 }
 0xa03   :  { %v5584_v7 = vpop.f32.mrb[32].mxu0 }
 0xa04   :  { %v5617_v8 = vpop.f32.mrb[30].mxu1  ;;  %v3050_v9 = vpop.f32.mrb[33].mxu0 }
 0xa05   :  { %v6009_v10 = vpack.c.bf16 %v5584_v7, %v3050_v9  ;;  %v3292_v12 = vpop.f32.mrb[31].mxu1 }
 0xa06   :  { %v6023_v13 = vpack.c.bf16 %v5617_v8, %v3292_v12 }
 0xa07   :  { %6011 = vmatprep.subr.msk.bf16.mxu0 %vm6502_vm2, %v6009_v10 }
 0xa08   :  { %5641 = vmatmul.mubr.msk.f32.vlgmr.msra.gmra.mrb[38].mxu0 %vm1030_vm1, %v5518_v53 }
 0xa09   :  { %6014 = vmatpush3.bf16.xpose.msk.msra.mxu0 %vm6502_vm2, %v6009_v10  ;;  %5654 = vmatprep.mubr.msk.f32.mxu0 %vm1030_vm1, %v2733_v62 }
 0xa0a   :  { %6024 = vmatprep.subr.bf16.mxu0 %v6023_v13 }
 0xa0b   :  { %v5606_v14 = vpop.f32.mrb[34].mxu0 }
 0xa0c   :  { %v3217_v15 = vpop.f32.mrb[35].mxu0 }
 0xa0d   :  { %v6918_v16 = vpack.c.bf16 %v5606_v14, %v3217_v15 }
 0xa0f   :  { %6020 = vmatprep.subr.bf16.mxu1 %v6918_v16 }
 0xa10   :  { %5655 = vmatmul.mubr.msk.f32.vlgmr.msra.gmra.mrb[40].mxu0 %vm1030_vm1, %v5540_v58 }
 0xa11   :  { %6026 = vmatpush3.bf16.msra.mxu0 %v6023_v13 }
 0xa13   :  { %v5628_v17 = vpop.f32.mrb[36].mxu0 }
 0xa14   :  { %v3367_v18 = vpop.f32.mrb[37].mxu0 }
 0xa15   :  { %v6922_v19 = vpack.c.bf16 %v5628_v17, %v3367_v18 }
 0xaca   :  { %v5635_v20 = vpop.f32.mrb[32].mxu1 }
 0xacb   :  { %v3460_v22 = vadd.f32 %v5635_v20, %v6546_v48  ;;  %v3454_v21 = vpop.f32.mrb[33].mxu1 }
 0xacc   :  { %v3455_v24 = vadd.f32 %v3454_v21, %v6536_v45 }
 0xacd   :  { %v3727_v25 = vsel %vm1379_vm3, %v3460_v22, -inf }
 0xace   :  { %3728 = vmax.xlane.f32.xlu1 %v3727_v25  ;;  %v3724_v38 = vsel %vm1379_vm3, %v3455_v24, -inf }
 0xacf   :  { %3725 = vmax.xlane.f32.xlu0 %v3724_v38 }
 0xad3   :  { %v5649_v26 = vpop.f32.mrb[34].mxu1 }
 0xad4   :  { %v3628_v27 = vpop.f32.mrb[35].mxu1  ;;  %v3634_v31 = vadd.f32 %v5649_v26, %v6562_v59 }
 0xad5   :  { %v3629_v45 = vadd.f32 %v3628_v27, %v6567_v60 }
 0xad6   :  { %v3739_v33 = vsel %vm1379_vm3, %v3634_v31, -inf }
 0xad7   :  { %v3736_v35 = vsel %vm1379_vm3, %v3629_v45, -inf }
 0xadb   :  { %v5642_v28 = vpop.f32.mrb[38].mxu0 }
 0xadc   :  { %v3547_v29 = vadd.f32 %v5642_v28, %v6551_v51  ;;  %v3541_v41 = vpop.f32.mrb[39].mxu0 }
 0xadd   :  { %v3542_v30 = vadd.f32 %v3541_v41, %v6541_v47 }
 0xade   :  { %v3733_v48 = vsel %vm1379_vm3, %v3547_v29, -inf }
 0xadf   :  { %3734 = vmax.xlane.f32.xlu1 %v3733_v48  ;;  %v3730_v32 = vsel %vm1379_vm3, %v3542_v30, -inf }
 0xae0   :  { %3731 = vmax.xlane.f32.xlu0 %v3730_v32 }
 0xae3   :  { %3740 = vmax.xlane.f32.xlu1 %v3739_v33  ;;  %v5656_v34 = vpop.f32.mrb[40].mxu0 }
 0xae4   :  { %v3721_v51 = vadd.f32 %v5656_v34, %v6575_v1  ;;  %v3715_v36 = vpop.f32.mrb[41].mxu0  ;;  %3737 = vmax.xlane.f32.xlu0 %v3736_v35 }
 0xae5   :  { %v3716_v47 = vadd.f32 %v3715_v36, %v6580_v3 }
 0xae6   :  { %v3745_v59 = vsel %vm1379_vm3, %v3721_v51, -inf }
 0xae7   :  { %3746 = vmax.xlane.f32.xlu1 %v3745_v59  ;;  %v3742_v60 = vsel %vm1379_vm3, %v3716_v47, -inf }
 0xae8   :  { %3743 = vmax.xlane.f32.xlu0 %v3742_v60 }
 0xb5b   :  { %v3729_v37 = vpop.xlane.xlu1 %3728 }
 0xb5c   :  { %v3749_v39 = vsub.f32 %v3460_v22, %v3729_v37  ;;  %v3726_v40 = vpop.xlane.xlu0 %3725 }
 0xb5d   :  { %v3748_v42 = vsub.f32 %v3455_v24, %v3726_v40 }
 0xb5e   :  { %v3758_v43 = vmul.f32 1.442695, %v3749_v39 }
 0xb5f   :  { %v3756_v44 = vmul.f32 1.442695, %v3748_v42  ;;  %v4953_v42 = vld [vmem:[%s7072_s5 + $0x20] sm:$0xff] }
 0xb60   :  { %6115 = vpow2.f32 %v3758_v43  ;;  %5685 = vmatprep.subr.mxu0 %v4953_v42 }
 0xb61   :  { %6117 = vpow2.f32 %v3756_v44 }
 0xb6a   :  { %v6116_v46 = vpop.eup %6115 }
 0xb6b   :  { %v6118_v1 = vpop.eup %6117  ;;  %v3775_v52 = vsel %vm1379_vm3, %v6116_v46, 0.0 }
 0xb6c   :  { %v3735_v53 = vpop.xlane.xlu1 %3734  ;;  %3776 = vadd.xlane.f32.xlu1 %v3775_v52  ;;  %v3772_v3 = vsel %vm1379_vm3, %v6118_v1, 0.0 }
 0xb6d   :  { %v3751_v54 = vsub.f32 %v3547_v29, %v3735_v53  ;;  %v3732_v55 = vpop.xlane.xlu0 %3731  ;;  %3773 = vadd.xlane.f32.xlu0 %v3772_v3  ;;  %v4956_v53 = vld [vmem:[%s7072_s5 + $0x38] sm:$0xff] }
 0xb6e   :  { %v3750_v56 = vsub.f32 %v3542_v30, %v3732_v55 }
 0xb6f   :  { %v3762_v57 = vmul.f32 1.442695, %v3751_v54 }
 0xb70   :  { %v3760_v58 = vmul.f32 1.442695, %v3750_v56  ;;  %v3741_v61 = vpop.xlane.xlu1 %3740 }
 0xb71   :  { %6119 = vpow2.f32 %v3762_v57  ;;  %v3753_v62 = vsub.f32 %v3634_v31, %v3741_v61  ;;  %v3738_v63 = vpop.xlane.xlu0 %3737  ;;  %v4966_v57 = vld [vmem:[%s7073_s6 + $0x1] ss:$0 sm:$0xff] }
 0xb72   :  { %6121 = vpow2.f32 %v3760_v58  ;;  %v3752_v0 = vsub.f32 %v3629_v45, %v3738_v63 }
 0xb73   :  { %v3766_v23 = vmul.f32 1.442695, %v3753_v62 }
 0xb74   :  { %v3764_v11 = vmul.f32 1.442695, %v3752_v0  ;;  %v3747_v2 = vpop.xlane.xlu1 %3746 }
 0xb75   :  { %6123 = vpow2.f32 %v3766_v23  ;;  %v3755_v4 = vsub.f32 %v3721_v51, %v3747_v2  ;;  %v3744_v5 = vpop.xlane.xlu0 %3743 }
 0xb76   :  { %6125 = vpow2.f32 %v3764_v11  ;;  %v3754_v6 = vsub.f32 %v3716_v47, %v3744_v5 }
 0xb77   :  { %v3770_v7 = vmul.f32 1.442695, %v3755_v4 }
 0xb78   :  { %v3768_v8 = vmul.f32 1.442695, %v3754_v6 }
 0xb79   :  { %6127 = vpow2.f32 %v3770_v7 }
 0xb7a   :  { %6129 = vpow2.f32 %v3768_v8 }
 0xb7b   :  { %v6120_v9 = vpop.eup %6119 }
 0xb7c   :  { %v6122_v10 = vpop.eup %6121  ;;  %v3781_v12 = vsel %vm1379_vm3, %v6120_v9, 0.0 }
 0xb7d   :  { %3782 = vadd.xlane.f32.xlu1 %v3781_v12  ;;  %v3778_v13 = vsel %vm1379_vm3, %v6122_v10, 0.0 }
 0xb7e   :  { %3779 = vadd.xlane.f32.xlu0 %v3778_v13 }
 0xb7f   :  { %v6124_v14 = vpop.eup %6123 }
 0xb80   :  { %v6126_v15 = vpop.eup %6125  ;;  %v3787_v17 = vsel %vm1379_vm3, %v6124_v14, 0.0 }
 0xb81   :  { %3788 = vadd.xlane.f32.xlu1 %v3787_v17  ;;  %v3784_v18 = vsel %vm1379_vm3, %v6126_v15, 0.0  ;;  %v4973_v17 = vld [vmem:[%s7078_s11 + $0x30] sm:$0xff] }
 0xb82   :  { %3785 = vadd.xlane.f32.xlu0 %v3784_v18  ;;  %v4974_v18 = vld [vmem:[%s7078_s11 + $0x38] sm:$0xff] }
 0xb83   :  { %v6128_v20 = vpop.eup %6127 }
 0xb84   :  { %v6130_v22 = vpop.eup %6129  ;;  %v3793_v21 = vsel %vm1379_vm3, %v6128_v20, 0.0 }
 0xb85   :  { %3794 = vadd.xlane.f32.xlu1 %v3793_v21  ;;  %v3790_v24 = vsel %vm1379_vm3, %v6130_v22, 0.0  ;;  %v4980_v21 = vld [vmem:[%s7080_s13 + $0x48] sm:$0xff] }
 0xb86   :  { %3791 = vadd.xlane.f32.xlu0 %v3790_v24 }
 0xbf9   :  { %v3777_v25 = vpop.xlane.xlu1 %3776 }
 0xbfa   :  { %6131 = vrcp.f32 %v3777_v25  ;;  %v3774_v38 = vpop.xlane.xlu0 %3773 }
 0xbfb   :  { %6133 = vrcp.f32 %v3774_v38 }
 0xc04   :  { %v6132_v26 = vpop.eup %6131 }
 0xc05   :  { %v6134_v27 = vpop.eup %6133  ;;  %v3799_v29 = vmul.f32 %v6132_v26, %v6116_v46  ;;  %v4955_v46 = vld [vmem:[%s7072_s5 + $0x30] sm:$0xff] }
 0xc06   :  { %v3797_v28 = vmul.f32 %v6134_v27, %v6118_v1 }
 0xc08   :  { %5661 = vmatprep.mubr.msk.f32.mxu1 %vm1379_vm3, %v3797_v28 }
 0xc09   :  { %5662 = vmatmul.mubr.msk.f32.vlgmr.msra.gmra.mrb[36].mxu1 %vm1379_vm3, %v3799_v29 }
 0xc0a   :  { %v3783_v41 = vpop.xlane.xlu1 %3782  ;;  %6022 = vmatpush3.bf16.msra.mxu1 %v6918_v16 }
 0xc0b   :  { %6135 = vrcp.f32 %v3783_v41  ;;  %6028 = vmatprep.subr.bf16.mxu1 %v6922_v19  ;;  %v3780_v30 = vpop.xlane.xlu0 %3779 }
 0xc0c   :  { %6137 = vrcp.f32 %v3780_v30  ;;  %v4969_v30 = vld [vmem:[%s7074_s7 + $0x1] ss:$0 sm:$0xff] }
 0xc0e   :  { %v3789_v31 = vpop.xlane.xlu1 %3788 }
 0xc0f   :  { %6139 = vrcp.f32 %v3789_v31  ;;  %v3786_v48 = vpop.xlane.xlu0 %3785 }
 0xc10   :  { %6141 = vrcp.f32 %v3786_v48 }
 0xc12   :  { %v3795_v45 = vpop.xlane.xlu1 %3794 }
 0xc13   :  { %6143 = vrcp.f32 %v3795_v45  ;;  %v3792_v32 = vpop.xlane.xlu0 %3791 }
 0xc14   :  { %6145 = vrcp.f32 %v3792_v32  ;;  %v4970_v32 = vld [vmem:[%s7075_s8 + $0x1] ss:$0 sm:$0xff] }
 0xc15   :  { %v6136_v33 = vpop.eup %6135 }
 0xc16   :  { %v6138_v34 = vpop.eup %6137  ;;  %v3803_v51 = vmul.f32 %v6136_v33, %v6120_v9 }
 0xc17   :  { %v3801_v35 = vmul.f32 %v6138_v34, %v6122_v10 }
 0xc19   :  { %v6140_v36 = vpop.eup %6139  ;;  %5668 = vmatprep.mubr.msk.f32.mxu1 %vm1379_vm3, %v3801_v35  ;;  %v4981_v35 = vld [vmem:[%s7080_s13 + $0x50] sm:$0xff] }
 0xc1a   :  { %v6142_v16 = vpop.eup %6141  ;;  %5669 = vmatmul.mubr.msk.f32.vlgmr.msra.gmra.mrb[38].mxu1 %vm1379_vm3, %v3803_v51  ;;  %v3807_v59 = vmul.f32 %v6140_v36, %v6124_v14  ;;  %v4972_v14 = vld [vmem:[%s7078_s11 + $0x28] sm:$0xff]  ;;  %v4982_v51 = vld [vmem:[%s7080_s13 + $0x58] sm:$0xff] }
 0xc1b   :  { %6030 = vmatpush3.bf16.msra.mxu1 %v6922_v19  ;;  %v3805_v47 = vmul.f32 %v6142_v16, %v6126_v15  ;;  %v4954_v19 = vld [vmem:[%s7072_s5 + $0x28] sm:$0xff] }
 0xc1d   :  { %v6144_v60 = vpop.eup %6143  ;;  %5675 = vmatprep.mubr.msk.f32.mxu0 %vm1379_vm3, %v3805_v47  ;;  %v6043_v47 = vpack.c.bf16 %v4982_v51, %v4981_v35 }
 0xc1e   :  { %v6146_v37 = vpop.eup %6145  ;;  %5676 = vmatmul.mubr.msk.f32.vlgmr.msra.gmra.mrb[42].mxu0 %vm1379_vm3, %v3807_v59  ;;  %v3811_v40 = vmul.f32 %v6144_v60, %v6128_v20  ;;  %v6035_v20 = vpack.c.bf16 %v4974_v18, %v4973_v17  ;;  %v4983_v59 = vld [vmem:[%s7080_s13 + $0x60] sm:$0xff]  ;;  %v4984_v60 = vld [vmem:[%s7080_s13 + $0x68] sm:$0xff] }
 0xc1f   :  { %v3809_v39 = vmul.f32 %v6146_v37, %v6130_v22  ;;  %5686 = vmatpush3.msra.mxu0 %v4953_v42  ;;  %v4979_v22 = vld [vmem:[%s7080_s13 + $0x40] sm:$0xff]  ;;  %v6047_v37 = vpack.c.bf16 %v4984_v60, %v4983_v59 }
 0xc20   :  { %5690 = vmatprep.subr.mxu0 %v4954_v19  ;;  %v6039_v24 = vpack.c.bf16 %v4980_v21, %v4979_v22  ;;  %v4993_v17 = vld [vmem:[%s7076_s9 + $0x1] ss:$0 sm:$0xff] }
 0xc21   :  { %5682 = vmatprep.mubr.msk.f32.mxu1 %vm1379_vm3, %v3809_v39  ;;  %v4985_v39 = vld [vmem:[%s7080_s13 + $0x70] sm:$0xff]  ;;  %v4994_v21 = vld [vmem:[%s7077_s10 + $0x1] ss:$0 sm:$0xff] }
 0xc22   :  { %5683 = vmatmul.mubr.msk.f32.vlgmr.msra.gmra.mrb[40].mxu1 %vm1379_vm3, %v3811_v40  ;;  %v4986_v40 = vld [vmem:[%s7080_s13 + $0x78] sm:$0xff] }
 0xc23   :  { %v6051_v42 = vpack.c.bf16 %v4986_v40, %v4985_v39 }
 0xcdc   :  { %v5663_v43 = vpop.f32.mrb[36].mxu1 }
 0xcdd   :  { %v3884_v44 = vpop.f32.mrb[37].mxu1 }
 0xcde   :  { %5687 = vmatprep.mubr.msk.f32.mxu0 %vm1030_vm1, %v3884_v44 }
 0xcdf   :  { %5688 = vmatmul.mubr.msk.f32.vlgmr.msra.gmra.mrb[44].mxu0 %vm1030_vm1, %v5663_v43 }
 0xce0   :  { %5691 = vmatpush3.msra.mxu0 %v4954_v19  ;;  %v4976_v19 = vld [vmem:[%s7079_s12 + $0x1] ss:$0 sm:$0xff] }
 0xce1   :  { %5695 = vmatprep.subr.mxu0 %v4955_v46 }
 0xced   :  { %v5670_v1 = vpop.f32.mrb[38].mxu1 }
 0xcee   :  { %v3965_v52 = vpop.f32.mrb[39].mxu1 }
 0xcef   :  { %5692 = vmatprep.mubr.msk.f32.mxu0 %vm1030_vm1, %v3965_v52 }
 0xcf0   :  { %5693 = vmatmul.mubr.msk.f32.vlgmr.msra.gmra.mrb[44].mxu0 %vm1030_vm1, %v5670_v1 }
 0xcf1   :  { %5696 = vmatpush3.msra.mxu0 %v4955_v46  ;;  %v5677_v3 = vpop.f32.mrb[42].mxu0 }
 0xcf2   :  { %v4046_v54 = vpop.f32.mrb[43].mxu0  ;;  %5700 = vmatprep.subr.mxu0 %v4956_v53 }
 0xcf3   :  { %5697 = vmatprep.mubr.msk.f32.mxu0 %vm1030_vm1, %v4046_v54 }
 0xcf5   :  { %v5684_v55 = vpop.f32.mrb[40].mxu1 }
 0xcf6   :  { %v4127_v56 = vpop.f32.mrb[41].mxu1 }
 0xcf8   :  { %5698 = vmatmul.mubr.msk.f32.vlgmr.msra.gmra.mrb[44].mxu0 %vm1030_vm1, %v5677_v3  ;;  %v4988_v3 = vld [vmem:[%s7081_s14 + $0x1] ss:$0 sm:$0xff] }
 0xcf9   :  { %5701 = vmatpush3.msra.mxu0 %v4956_v53  ;;  %5702 = vmatprep.mubr.msk.f32.mxu0 %vm1030_vm1, %v4127_v56 }
 0xd00   :  { %5703 = vmatmul.mubr.msk.f32.vlgmr.msra.gmra.mrb[44].mxu0 %vm1030_vm1, %v5684_v55 }
 0xdd3   :  { %v5704_v58 = vpop.f32.mrb[44].mxu0 }
 0xdd4   :  { %v6057_v61 = vadd.f32 %v5704_v58, %v4966_v57  ;;  %v4456_v62 = vpop.f32.mrb[45].mxu0 }
 0xdd5   :  { %v6058_v63 = vadd.f32 %v4966_v57, %v4456_v62 }
 0xdd6   :  { %v4482_v0 = vadd.f32 %v6057_v61, %v6749_v50 }
 0xdd7   :  { %v4481_v23 = vadd.f32 %v6058_v63, %v6747_v49  ;;  %v4971_v49 = vld [vmem:[%s7078_s11 + $0x20] sm:$0xff]  ;;  %s6177_s11 = scalar_lea.vmem %s4779_s20, 256 }
 0xdd8   :  { %v4490_v11 = vsel %vm91_vm0, %v4482_v0, 0.0  ;;  %v6031_v15 = vpack.c.bf16 %v4972_v14, %v4971_v49  ;;  %p6178_p8 = scmp.ne.s32.totalorder %s4779_s20, %s6177_s11  ;;  %p6183_p10 = scmp.lt.s32.totalorder %s6177_s11, %s6177_s11 }
 0xdd9   :  { %4491 = vadd.xlane.f32.xlu1 %v4490_v11  ;;  %v4487_v2 = vsel %vm91_vm0, %v4481_v23, 0.0 }
 0xdda   :  { %4488 = vadd.xlane.f32.xlu0 %v4487_v2  ;;  %6032 = vmatprep.subr.bf16.mxu1 %v6031_v15  ;;  %p6184_p11 = por %p6183_p10, %p6182_p9 }
 0xddb   :  { %6034 = vmatpush3.bf16.msra.mxu1 %v6031_v15 }
 0xddc   :  { %6036 = vmatprep.subr.bf16.mxu1 %v6035_v20  ;;  %p6185_p12 = pnand %p6184_p11, %p6178_p8 }
 0xddf   :  { %6038 = vmatpush3.bf16.msra.mxu1 %v6035_v20 }
 0xde0   :  { %6040 = vmatprep.subr.bf16.mxu1 %v6039_v24 }
 0xe66   :  { %v4492_v4 = vpop.xlane.xlu1 %4491 }
 0xe67   :  { %v4494_v5 = vmul.f32 0.03125, %v4492_v4  ;;  %v4489_v6 = vpop.xlane.xlu0 %4488 }
 0xe68   :  { %v4493_v7 = vmul.f32 0.03125, %v4489_v6 }
 0xe69   :  { %v4496_v8 = vsub.f32 %v4482_v0, %v4494_v5 }
 0xe6a   :  { %v4495_v9 = vsub.f32 %v4481_v23, %v4493_v7 }
 0xe6b   :  { %v4498_v10 = vmul.f32 %v4496_v8, %v4496_v8 }
 0xe6c   :  { %v4497_v12 = vmul.f32 %v4495_v9, %v4495_v9 }
 0xe6d   :  { %v4502_v13 = vsel %vm91_vm0, %v4498_v10, 0.0 }
 0xe6e   :  { %4503 = vadd.xlane.f32.xlu1 %v4502_v13  ;;  %v4499_v50 = vsel %vm91_vm0, %v4497_v12, 0.0 }
 0xe6f   :  { %4500 = vadd.xlane.f32.xlu0 %v4499_v50 }
 0xefb   :  { %v4504_v25 = vpop.xlane.xlu1 %4503 }
 0xefc   :  { %v4506_v38 = vmul.f32 0.03125, %v4504_v25  ;;  %v4501_v26 = vpop.xlane.xlu0 %4500 }
 0xefd   :  { %v4505_v27 = vmul.f32 0.03125, %v4501_v26 }
 0xefe   :  { %v4508_v28 = vadd.f32 1e-05, %v4506_v38 }
 0xeff   :  { %v4507_v29 = vadd.f32 1e-05, %v4505_v27 }
 0xf00   :  { %6147 = vrsqrt.f32 %v4508_v28 }
 0xf01   :  { %6149 = vrsqrt.f32 %v4507_v29 }
 0xf0a   :  { %v6148_v41 = vpop.eup %6147 }
 0xf0b   :  { %v6150_v31 = vpop.eup %6149  ;;  %v4512_v48 = vmul.f32 %v6148_v41, %v4496_v8 }
 0xf0c   :  { %v4511_v45 = vmul.f32 %v6150_v31, %v4495_v9 }
 0xf0d   :  { %v4520_v33 = vmul.f32 %v4969_v30, %v4512_v48 }
 0xf0e   :  { %v4519_v34 = vmul.f32 %v4969_v30, %v4511_v45 }
 0xf0f   :  { %v4528_v16 = vadd.f32 %v4970_v32, %v4520_v33 }
 0xf10   :  { %v4527_v36 = vadd.f32 %v4970_v32, %v4519_v34 }
 0xf12   :  { %5713 = vmatprep.mubr.msk.f32.mxu1 %vm91_vm0, %v4527_v36 }
 0xf13   :  { %5714 = vmatmul.mubr.msk.f32.vlgmr.msra.gmra.mrb[42].mxu1 %vm91_vm0, %v4528_v16 }
 0xf14   :  { %6042 = vmatpush3.bf16.msra.mxu1 %v6039_v24 }
 0xf15   :  { %6044 = vmatprep.subr.bf16.mxu1 %v6043_v47 }
 0xf18   :  { %6046 = vmatpush3.bf16.msra.mxu1 %v6043_v47 }
 0xf19   :  { %6048 = vmatprep.subr.bf16.mxu1 %v6047_v37 }
 0xf1c   :  { %6050 = vmatpush3.bf16.msra.mxu1 %v6047_v37 }
 0xf1d   :  { %6052 = vmatprep.subr.bf16.mxu1 %v6051_v42 }
 0xf20   :  { %6054 = vmatpush3.bf16.msra.mxu1 %v6051_v42 }
 0xfe6   :  { %v5715_v43 = vpop.f32.mrb[42].mxu1 }
 0xfe7   :  { %v4620_v44 = vadd.f32 %v5715_v43, %v4976_v19  ;;  %v4614_v46 = vpop.f32.mrb[43].mxu1 }
 0xfe8   :  { %v4615_v1 = vadd.f32 %v4976_v19, %v4614_v46 }
 0xfe9   :  { %v4624_v53 = vmax.f32 %v4620_v44, 0.0 }
 0xfea   :  { %v4623_v52 = vmax.f32 %v4615_v1, 0.0 }
 0xfec   :  { %5732 = vmatprep.mubr.msk.f32.mxu1 %vm2291_vm4, %v4623_v52 }
 0xfed   :  { %5733 = vmatmul.mubr.msk.f32.vlgmr.msra.gmra.mrb[44].mxu1 %vm2291_vm4, %v4624_v53 }
0x10c0   :  { %v5734_v54 = vpop.f32.mrb[44].mxu1 }
0x10c1   :  { %v4720_v55 = vadd.f32 %v5734_v54, %v4988_v3  ;;  %v4714_v56 = vpop.f32.mrb[45].mxu1 }
0x10c2   :  { %v4715_v57 = vadd.f32 %v4988_v3, %v4714_v56 }
0x10c3   :  { %v4724_v58 = vadd.f32 %v4720_v55, %v4528_v16 }
0x10c4   :  { %v4723_v61 = vadd.f32 %v4715_v57, %v4527_v36 }
0x10c5   :  { %v4732_v62 = vsel %vm91_vm0, %v4724_v58, 0.0 }
0x10c6   :  { %4733 = vadd.xlane.f32.xlu1 %v4732_v62  ;;  %v4729_v63 = vsel %vm91_vm0, %v4723_v61, 0.0 }
0x10c7   :  { %4730 = vadd.xlane.f32.xlu0 %v4729_v63 }
0x1153   :  { %v4734_v0 = vpop.xlane.xlu1 %4733 }
0x1154   :  { %v4736_v23 = vmul.f32 0.03125, %v4734_v0  ;;  %v4731_v11 = vpop.xlane.xlu0 %4730 }
0x1155   :  { %v4735_v2 = vmul.f32 0.03125, %v4731_v11 }
0x1156   :  { %v4738_v4 = vsub.f32 %v4724_v58, %v4736_v23 }
0x1157   :  { %v4737_v5 = vsub.f32 %v4723_v61, %v4735_v2 }
0x1158   :  { %v4740_v6 = vmul.f32 %v4738_v4, %v4738_v4 }
0x1159   :  { %v4739_v7 = vmul.f32 %v4737_v5, %v4737_v5 }
0x115a   :  { %v4744_v8 = vsel %vm91_vm0, %v4740_v6, 0.0 }
0x115b   :  { %4745 = vadd.xlane.f32.xlu1 %v4744_v8  ;;  %v4741_v9 = vsel %vm91_vm0, %v4739_v7, 0.0 }
0x115c   :  { %4742 = vadd.xlane.f32.xlu0 %v4741_v9 }
0x11e8   :  { %v4746_v10 = vpop.xlane.xlu1 %4745 }
0x11e9   :  { %v4748_v12 = vmul.f32 0.03125, %v4746_v10  ;;  %v4743_v13 = vpop.xlane.xlu0 %4742 }
0x11ea   :  { %v4747_v50 = vmul.f32 0.03125, %v4743_v13 }
0x11eb   :  { %v4750_v49 = vadd.f32 1e-05, %v4748_v12 }
0x11ec   :  { %v4749_v14 = vadd.f32 1e-05, %v4747_v50 }
0x11ed   :  { %6151 = vrsqrt.f32 %v4750_v49 }
0x11ee   :  { %6153 = vrsqrt.f32 %v4749_v14 }
0x11f7   :  { %v6152_v15 = vpop.eup %6151 }
0x11f8   :  { %v6154_v18 = vpop.eup %6153  ;;  %v4754_v20 = vmul.f32 %v6152_v15, %v4738_v4 }
0x11f9   :  { %v4753_v22 = vmul.f32 %v6154_v18, %v4737_v5 }
0x11fa   :  { %v4762_v24 = vmul.f32 %v4993_v17, %v4754_v20 }
0x11fb   :  { %v4761_v25 = vmul.f32 %v4993_v17, %v4753_v22 }
0x11fc   :  { %v4770_v38 = vadd.f32 %v4994_v21, %v4762_v24 }
0x11fd   :  { %v4769_v26 = vadd.f32 %v4994_v21, %v4761_v25 }
0x11fe   :  { %4772 = vst.msk [vmem:[#allocation5 + $0x8] sm:$0xff] %vm91_vm0, %v4770_v38 }
0x11ff   :  { %4771 = vst.msk [vmem:[#allocation5] sm:$0xff] %vm91_vm0, %v4769_v26 }
0x1200   :  { %6188 = shalt.err (!%p6185_p12)
}
0x1201   :  { %s6189_s21 = scalar_lea.hbm %s7082_s15, 256 }
0x1202   :  { %p6190_p13 = scmp.ne.s32.totalorder %s7082_s15, %s6189_s21  ;;  %p6193_p0 = scmp.lt.u32.totalorder %s6189_s21, %s7082_s15 }
0x1204   :  { %p6195_p1 = pnand %p6193_p0, %p6190_p13 }
0x1206   :  { %6198 = shalt.err (!%p6195_p1)
}
0x1207   :  { %4784 = dma.vmem_to_hbm [thread:$0]  %s4779_s20, 256, %s7082_s15, [#allocation4], %s6204_s28, %s6204_s28, %s6205_s29  }
0x1208   :  { %6201 = dma.done.wait [#allocation4], 256  }
0x1209   :  { %6202 = vsyncadd [#allocation4], 4294967040 }
0x120a   :  { %4788 = vsyncpa [#allocation3], 1 }
0x120b   :  { %4789 = vsyncpa [#allocation4], 1 }

</bundles_post_ra>
